<compile_context>
chip_gen: v7x
topology: tpu7x:2x2x1
jax: 0.10.0
libtpu: 0.0.40
codegen_flags: <defaults>
</compile_context>

<pallas_src>
import functools

import jax
import jax.numpy as jnp
from jax import lax
from jax.experimental import pallas as pl
from jax.experimental.pallas import tpu as pltpu

BN_EPS = 0.001


# ----------------------------------------------------------------------------
# Fused MBConv kernel
# ----------------------------------------------------------------------------
def _mbconv_fused_kernel(*refs, K, stride, TH, Wo, Wp, has_expand, mxu_dtype):
    """One grid step = one batch element x one TH-row slab of the output.

    refs (has_expand=True):
        x_ref  : (1, Hp*Wp, Cin)  whole padded image, flattened rows (resident per n)
        m_ref  : (Hp*Wp, 1)       1.0 inside the original image, 0.0 on padding
        w1_ref : (Cin, F)         expand weight, BN1 scale folded in
        b1_ref : (1, F)           BN1 bias
        wd_ref : (K*K, F)         depthwise weight, BN2 scale folded in
        b2_ref : (1, F)           BN2 bias
        w3_ref : (F, Cout_p)      projection weight (Cout padded to 128), BN3 folded
        b3_ref : (1, Cout_p)      BN3 bias (padded)
        o_ref  : (1, TH*Wo, Cout_p)
        e_ref  : VMEM (TH_in*Wp, F)  expanded halo slab scratch
        dw_ref : VMEM (TH*Wo, F)     depthwise output slab scratch
    """
    if has_expand:
        (x_ref, m_ref, w1_ref, b1_ref, wd_ref, b2_ref, w3_ref, b3_ref,
         o_ref, e_ref, dw_ref) = refs
    else:
        (x_ref, m_ref, wd_ref, b2_ref, w3_ref, b3_ref,
         o_ref, e_ref, dw_ref) = refs
        del m_ref  # padded input is already zero; no mask needed

    S = stride
    TH_in = (TH - 1) * S + K            # input rows needed for TH output rows
    in_rows = TH_in * Wp
    i = pl.program_id(1)
    in_base = pl.multiple_of(i * (TH * S * Wp), TH * S * Wp)

    # ---- stage 1: 1x1 expand conv (BN scale folded into w1) + ReLU6 ---------
    x2d = x_ref[0, pl.ds(in_base, in_rows), :]            # (in_rows, Cin)
    if has_expand:
        e = jnp.dot(x2d.astype(mxu_dtype), w1_ref[...],
                    preferred_element_type=jnp.float32)
        e = jnp.clip(e + b1_ref[...], 0.0, 6.0)
        # Re-zero padded border pixels: the expand bias would otherwise leak a
        # nonzero value into what must be the depthwise's zero padding.
        e_ref[...] = e * m_ref[pl.ds(in_base, in_rows), :]
    else:
        e_ref[...] = x2d.astype(jnp.float32)

    # ---- stage 2: KxK depthwise conv (BN scale folded into wd) + ReLU6 ------
    wd = wd_ref[...]                                      # (K*K, F)
    b2 = b2_ref[...]                                      # (1, F)
    taps = [wd[t, :] for t in range(K * K)]               # hoisted tap vectors
    for r in range(TH):                                   # one output row at a time
        acc = None
        for ky in range(K):
            row_base = (r * S + ky) * Wp
            for kx in range(K):
                if S == 1:
                    win = e_ref[pl.ds(row_base + kx, Wo), :]
                else:
                    win = e_ref[pl.ds(row_base + kx, Wo, stride=S), :]
                term = win * taps[ky * K + kx]
                acc = term if acc is None else acc + term
        dw_ref[pl.ds(r * Wo, Wo), :] = jnp.clip(acc + b2, 0.0, 6.0)

    # ---- stage 3: 1x1 projection (BN scale folded into w3), lane-dense store
    out = jnp.dot(dw_ref[...].astype(mxu_dtype), w3_ref[...],
                  preferred_element_type=jnp.float32)
    o_ref[0] = (out + b3_ref[...]).astype(o_ref.dtype)


# ----------------------------------------------------------------------------
# Module
# ----------------------------------------------------------------------------
def _fold_bn(gamma, beta, mean, var, eps=BN_EPS):
    scale = gamma / jnp.sqrt(var + eps)
    bias = beta - mean * scale
    return scale.astype(jnp.float32), bias.astype(jnp.float32)


def _round_up(x, m):
    return ((x + m - 1) // m) * m


class MBInvertedConvLayerPallas:
    def __init__(self, in_channels, out_channels, kernel_size=3, stride=1,
                 expand_ratio=6, th_target=8, mxu_dtype=jnp.float32, key=None):
        assert kernel_size % 2 == 1
        self.in_channels = in_channels
        self.out_channels = out_channels
        self.kernel_size = kernel_size
        self.stride = stride
        self.expand_ratio = expand_ratio
        self.th_target = th_target          # output rows per grid step (8 keeps TH*Wo 8-aligned)
        self.mxu_dtype = mxu_dtype          # bf16 recommended on v6e/v7x; f32 here for exactness
        self.feature_dim = (round(in_channels * expand_ratio)
                            if expand_ratio > 1 else in_channels)
        F = self.feature_dim
        K = kernel_size
        self.cout_p = _round_up(out_channels, 128)   # lane-dense output slab

        if key is None:
            key = jax.random.PRNGKey(0)
        ks = jax.random.split(key, 15)

        def bn_params(k0, k1, k2, k3, c):
            gamma = jax.random.uniform(k0, (c,), jnp.float32, 0.5, 1.5)
            beta = 0.1 * jax.random.normal(k1, (c,), jnp.float32)
            mean = 0.1 * jax.random.normal(k2, (c,), jnp.float32)
            var = jax.random.uniform(k3, (c,), jnp.float32, 0.5, 1.5)
            return _fold_bn(gamma, beta, mean, var)

        # --- raw parameters (also used by the pure-JAX reference) -----------
        if expand_ratio > 1:
            self.w_expand = 0.3 * jax.random.normal(
                ks[0], (in_channels, F), jnp.float32)            # (Cin, F)
            self.scale1, self.bias1 = bn_params(ks[1], ks[2], ks[3], ks[4], F)
        else:
            self.w_expand = None
        self.w_dw = 0.3 * jax.random.normal(ks[5], (K, K, F), jnp.float32)
        self.scale2, self.bias2 = bn_params(ks[6], ks[7], ks[8], ks[9], F)
        self.w_pw = 0.3 * jax.random.normal(ks[10], (F, out_channels), jnp.float32)
        self.scale3, self.bias3 = bn_params(ks[11], ks[12], ks[13], ks[14],
                                            out_channels)

        # --- kernel parameters: BN scale folded into conv weights -----------
        if expand_ratio > 1:
            self.k_w1 = (self.w_expand * self.scale1).astype(mxu_dtype)   # (Cin, F)
            self.k_b1 = self.bias1.reshape(1, F)
        else:
            self.k_w1 = None
            self.k_b1 = None
        self.k_wd = (self.w_dw * self.scale2).reshape(K * K, F)           # f32 (VPU)
        self.k_b2 = self.bias2.reshape(1, F)
        pad_c = self.cout_p - out_channels
        self.k_w3 = jnp.pad(self.w_pw * self.scale3,
                            ((0, 0), (0, pad_c))).astype(mxu_dtype)       # (F, Cout_p)
        self.k_b3 = jnp.pad(self.bias3, (0, pad_c)).reshape(1, self.cout_p)

    # ------------------------------------------------------------------ call
    def __call__(self, x_nchw):
        N, C, H, W = x_nchw.shape
        assert C == self.in_channels
        K, S, F = self.kernel_size, self.stride, self.feature_dim
        has_expand = self.w_expand is not None
        pad = K // 2
        Ho = (H + 2 * pad - K) // S + 1
        Wo = (W + 2 * pad - K) // S + 1

        # output row tile; with >1 tiles, TH*Wo must stay sublane (8) aligned
        TH = Ho if Ho <= self.th_target else self.th_target
        n_tiles = -(-Ho // TH)
        if n_tiles > 1 and (TH * Wo) % 8 != 0:
            # TODO(synk): pick an aligned TH instead of the whole-image fallback.
            TH, n_tiles = Ho, 1
        Ho_p = n_tiles * TH
        TH_in = (TH - 1) * S + K

        # zero-pad the (cheap, Cin-channel) input spatially; extra bottom rows
        # cover the Ho -> Ho_p round-up so every tile's halo window is in range
        Wp = W + 2 * pad
        rows_needed = (Ho_p - 1) * S + K
        pad_bottom = max(pad, rows_needed - (H + pad))
        Hp = H + pad + pad_bottom
        hp_flat = Hp * Wp

        x = jnp.transpose(x_nchw, (0, 2, 3, 1))                   # NCHW -> NHWC
        x_pad = jnp.pad(x, ((0, 0), (pad, pad_bottom), (pad, pad), (0, 0)))
        x_flat = x_pad.reshape(N, hp_flat, C)

        # 1.0 on original pixels, 0.0 on padded border (used after the expand bias)
        row_ok = (jnp.arange(Hp) >= pad) & (jnp.arange(Hp) < pad + H)
        col_ok = (jnp.arange(Wp) >= pad) & (jnp.arange(Wp) < pad + W)
        mask = (row_ok[:, None] & col_ok[None, :]).astype(jnp.float32)
        mask = mask.reshape(hp_flat, 1)

        kern = functools.partial(
            _mbconv_fused_kernel, K=K, stride=S, TH=TH, Wo=Wo, Wp=Wp,
            has_expand=has_expand, mxu_dtype=self.mxu_dtype)

        in_specs = [
            # whole padded image: block index changes only with n -> stays
            # resident in VMEM across the row tiles of one image (halo reuse)
            pl.BlockSpec((1, hp_flat, C), lambda n, i: (n, 0, 0)),
            pl.BlockSpec((hp_flat, 1), lambda n, i: (0, 0)),
        ]
        args = [x_flat, mask]
        if has_expand:
            in_specs += [pl.BlockSpec((C, F), lambda n, i: (0, 0)),
                         pl.BlockSpec((1, F), lambda n, i: (0, 0))]
            args += [self.k_w1, self.k_b1]
        in_specs += [pl.BlockSpec((K * K, F), lambda n, i: (0, 0)),
                     pl.BlockSpec((1, F), lambda n, i: (0, 0)),
                     pl.BlockSpec((F, self.cout_p), lambda n, i: (0, 0)),
                     pl.BlockSpec((1, self.cout_p), lambda n, i: (0, 0))]
        args += [self.k_wd, self.k_b2, self.k_w3, self.k_b3]

        out_flat = pl.pallas_call(
            kern,
            out_shape=jax.ShapeDtypeStruct((N, Ho_p * Wo, self.cout_p),
                                           jnp.float32),
            grid=(N, n_tiles),
            in_specs=in_specs,
            out_specs=pl.BlockSpec((1, TH * Wo, self.cout_p),
                                   lambda n, i: (n, i, 0)),
            scratch_shapes=[
                pltpu.VMEM((TH_in * Wp, F), jnp.float32),   # expanded halo slab
                pltpu.VMEM((TH * Wo, F), jnp.float32),      # depthwise output slab
            ],
            compiler_params=pltpu.CompilerParams(
                dimension_semantics=("parallel", "arbitrary"),
                vmem_limit_bytes=32 * 1024 * 1024),
        )(*args)

        out = out_flat.reshape(N, Ho_p, Wo, self.cout_p)
        out = out[:, :Ho, :, :self.out_channels]            # drop row/channel padding
        return jnp.transpose(out, (0, 3, 1, 2))              # NHWC -> NCHW

    # ------------------------------------------------------------- reference
    # Pure-JAX reference (lax convs, BN folded the same exact way) for checking.
    def reference(self, x_nchw):
        x = jnp.transpose(x_nchw, (0, 2, 3, 1))
        dn = lax.conv_dimension_numbers(x.shape, (1, 1, 1, 1),
                                        ("NHWC", "HWIO", "NHWC"))
        K, F = self.kernel_size, self.feature_dim
        if self.w_expand is not None:
            w = (self.w_expand * self.scale1).reshape(1, 1, self.in_channels, F)
            x = lax.conv_general_dilated(x, w, (1, 1), "VALID",
                                         dimension_numbers=dn)
            x = jnp.clip(x + self.bias1, 0.0, 6.0)
        pad = K // 2
        w = (self.w_dw * self.scale2).reshape(K, K, 1, F)
        x = lax.conv_general_dilated(
            x, w, (self.stride, self.stride), ((pad, pad), (pad, pad)),
            dimension_numbers=dn, feature_group_count=F)
        x = jnp.clip(x + self.bias2, 0.0, 6.0)
        w = (self.w_pw * self.scale3).reshape(1, 1, F, self.out_channels)
        x = lax.conv_general_dilated(x, w, (1, 1), "VALID",
                                     dimension_numbers=dn)
        x = x + self.bias3
        return jnp.transpose(x, (0, 3, 1, 2))


# ----------------------------------------------------------------------------
# Test
# ----------------------------------------------------------------------------
def _check(layer, x, name):
    out = jax.block_until_ready(layer(x))
    ref = jax.block_until_ready(layer.reference(x))
    assert out.shape == ref.shape, (name, out.shape, ref.shape)
    err = float(jnp.max(jnp.abs(out - ref)))
    assert jnp.allclose(out, ref, atol=2e-3, rtol=2e-3), (name, err)
    return err


if __name__ == "__main__":
    key = jax.random.PRNGKey(0)
    k_in, k1, k2, k3 = jax.random.split(key, 4)

    N, Cin, H, W, Cout = 2, 4, 16, 16, 8
    x = jax.random.normal(k_in, (N, Cin, H, W), jnp.float32)   # NCHW like PyTorch

    # stride 1, expand 6: exercises the multi-row-tile halo path (Ho=16, TH=8)
    _check(MBInvertedConvLayerPallas(Cin, Cout, kernel_size=3, stride=1,
                                     expand_ratio=6, key=k1), x, "s1_e6")
    # stride 2, expand 6: exercises the strided depthwise path
    _check(MBInvertedConvLayerPallas(Cin, Cout, kernel_size=3, stride=2,
                                     expand_ratio=6, key=k2), x, "s2_e6")
    # expand_ratio 1: no inverted-bottleneck branch
    _check(MBInvertedConvLayerPallas(Cin, Cout, kernel_size=3, stride=1,
                                     expand_ratio=1, key=k3), x, "s1_e1")

    print("KERNEL_OK")
</pallas_src>

<mosaic_0001>
module attributes {stable_mosaic.version = 11 : i64} {
  func.func @_mbconv_fused_kernel(%arg0: i32, %arg1: i32, %arg2: memref<1x324x4xf32, #tpu.memory_space<vmem>>, %arg3: memref<324x1xf32, #tpu.memory_space<vmem>>, %arg4: memref<4x24xf32, #tpu.memory_space<vmem>>, %arg5: memref<1x24xf32, #tpu.memory_space<vmem>>, %arg6: memref<9x24xf32, #tpu.memory_space<vmem>>, %arg7: memref<1x24xf32, #tpu.memory_space<vmem>>, %arg8: memref<24x128xf32, #tpu.memory_space<vmem>>, %arg9: memref<1x128xf32, #tpu.memory_space<vmem>>, %arg10: memref<1x128x128xf32, #tpu.memory_space<vmem>>, %arg11: memref<180x24xf32, #tpu.memory_space<vmem>>, %arg12: memref<128x24xf32, #tpu.memory_space<vmem>>) attributes {dimension_semantics = [#tpu.dimension_semantics<parallel>, #tpu.dimension_semantics<arbitrary>], iteration_bounds = array<i64: 2, 2>, scalar_prefetch = 0 : i64, scratch_operands = 2 : i64, tpu.core_type = #tpu.core_type<tc>, window_params = [{transform_indices = @transform_0, window_bounds = array<i64: 1, 324, 4>}, {pipeline_mode = #tpu.pipeline_mode<synchronous>, transform_indices = @transform_1, window_bounds = array<i64: 324, 1>}, {pipeline_mode = #tpu.pipeline_mode<synchronous>, transform_indices = @transform_2, window_bounds = array<i64: 4, 24>}, {pipeline_mode = #tpu.pipeline_mode<synchronous>, transform_indices = @transform_3, window_bounds = array<i64: 1, 24>}, {pipeline_mode = #tpu.pipeline_mode<synchronous>, transform_indices = @transform_4, window_bounds = array<i64: 9, 24>}, {pipeline_mode = #tpu.pipeline_mode<synchronous>, transform_indices = @transform_5, window_bounds = array<i64: 1, 24>}, {pipeline_mode = #tpu.pipeline_mode<synchronous>, transform_indices = @transform_6, window_bounds = array<i64: 24, 128>}, {pipeline_mode = #tpu.pipeline_mode<synchronous>, transform_indices = @transform_7, window_bounds = array<i64: 1, 128>}, {transform_indices = @transform_8, window_bounds = array<i64: 1, 128, 128>}]} {
    %c144_i32 = arith.constant 144 : i32
    %0 = arith.muli %arg1, %c144_i32 : i32
    %1 = tpu.assume_multiple %0, 144 : i32
    %c0 = arith.constant 0 : index
    %2 = arith.index_cast %1 : i32 to index
    %c0_0 = arith.constant 0 : index
    %3 = vector.load %arg2[%c0, %2, %c0_0] : memref<1x324x4xf32, #tpu.memory_space<vmem>>, vector<1x180x4xf32>
    %4 = vector.shape_cast %3 : vector<1x180x4xf32> to vector<180x4xf32>
    %c0_1 = arith.constant 0 : index
    %c0_2 = arith.constant 0 : index
    %5 = vector.load %arg4[%c0_1, %c0_2] : memref<4x24xf32, #tpu.memory_space<vmem>>, vector<4x24xf32>
    %cst = arith.constant dense<0.000000e+00> : vector<180x24xf32>
    %6 = tpu.matmul %4, %5, %cst {dimension_numbers = #tpu.dot_dimension_numbers<[1], [0], [0], [1], [0, 0, 1, 1], [], []>} : vector<180x4xf32>, vector<4x24xf32>, vector<180x24xf32> -> vector<180x24xf32>
    %c0_3 = arith.constant 0 : index
    %c0_4 = arith.constant 0 : index
    %7 = vector.load %arg5[%c0_3, %c0_4] : memref<1x24xf32, #tpu.memory_space<vmem>>, vector<1x24xf32>
    %8 = vector.broadcast %7 : vector<1x24xf32> to vector<180x24xf32>
    %9 = arith.addf %6, %8 : vector<180x24xf32>
    %cst_5 = arith.constant 0.000000e+00 : f32
    %cst_6 = arith.constant 6.000000e+00 : f32
    %10 = vector.broadcast %cst_5 : f32 to vector<180x24xf32>
    %11 = arith.maximumf %10, %9 : vector<180x24xf32>
    %12 = vector.broadcast %cst_6 : f32 to vector<180x24xf32>
    %13 = arith.minimumf %12, %11 : vector<180x24xf32>
    %14 = arith.index_cast %1 : i32 to index
    %c0_7 = arith.constant 0 : index
    %15 = vector.load %arg3[%14, %c0_7] : memref<324x1xf32, #tpu.memory_space<vmem>>, vector<180x1xf32>
    %16 = vector.broadcast %15 : vector<180x1xf32> to vector<180x24xf32>
    %17 = arith.mulf %13, %16 : vector<180x24xf32>
    %c0_8 = arith.constant 0 : index
    %c0_9 = arith.constant 0 : index
    %18 = vector.load %arg11[%c0_8, %c0_9] : memref<180x24xf32, #tpu.memory_space<vmem>>, vector<180x24xf32>
    tpu.vector_store %arg11[%c0_8, %c0_9], %17 {strides = array<i32>} : memref<180x24xf32, #tpu.memory_space<vmem>>, vector<180x24xf32>,
    %c0_10 = arith.constant 0 : index
    %c0_11 = arith.constant 0 : index
    %19 = vector.load %arg6[%c0_10, %c0_11] : memref<9x24xf32, #tpu.memory_space<vmem>>, vector<9x24xf32>
    %c0_12 = arith.constant 0 : index
    %c0_13 = arith.constant 0 : index
    %20 = vector.load %arg7[%c0_12, %c0_13] : memref<1x24xf32, #tpu.memory_space<vmem>>, vector<1x24xf32>
    %21 = vector.extract_strided_slice %19 {offsets = [0, 0], sizes = [1, 24], strides = [1, 1]} : vector<9x24xf32> to vector<1x24xf32>
    %22 = vector.shape_cast %21 : vector<1x24xf32> to vector<24xf32>
    %23 = vector.extract_strided_slice %19 {offsets = [1, 0], sizes = [1, 24], strides = [1, 1]} : vector<9x24xf32> to vector<1x24xf32>
    %24 = vector.shape_cast %23 : vector<1x24xf32> to vector<24xf32>
    %25 = vector.extract_strided_slice %19 {offsets = [2, 0], sizes = [1, 24], strides = [1, 1]} : vector<9x24xf32> to vector<1x24xf32>
    %26 = vector.shape_cast %25 : vector<1x24xf32> to vector<24xf32>
    %27 = vector.extract_strided_slice %19 {offsets = [3, 0], sizes = [1, 24], strides = [1, 1]} : vector<9x24xf32> to vector<1x24xf32>
    %28 = vector.shape_cast %27 : vector<1x24xf32> to vector<24xf32>
    %29 = vector.extract_strided_slice %19 {offsets = [4, 0], sizes = [1, 24], strides = [1, 1]} : vector<9x24xf32> to vector<1x24xf32>
    %30 = vector.shape_cast %29 : vector<1x24xf32> to vector<24xf32>
    %31 = vector.extract_strided_slice %19 {offsets = [5, 0], sizes = [1, 24], strides = [1, 1]} : vector<9x24xf32> to vector<1x24xf32>
    %32 = vector.shape_cast %31 : vector<1x24xf32> to vector<24xf32>
    %33 = vector.extract_strided_slice %19 {offsets = [6, 0], sizes = [1, 24], strides = [1, 1]} : vector<9x24xf32> to vector<1x24xf32>
    %34 = vector.shape_cast %33 : vector<1x24xf32> to vector<24xf32>
    %35 = vector.extract_strided_slice %19 {offsets = [7, 0], sizes = [1, 24], strides = [1, 1]} : vector<9x24xf32> to vector<1x24xf32>
    %36 = vector.shape_cast %35 : vector<1x24xf32> to vector<24xf32>
    %37 = vector.extract_strided_slice %19 {offsets = [8, 0], sizes = [1, 24], strides = [1, 1]} : vector<9x24xf32> to vector<1x24xf32>
    %38 = vector.shape_cast %37 : vector<1x24xf32> to vector<24xf32>
    %c0_14 = arith.constant 0 : index
    %c0_15 = arith.constant 0 : index
    %39 = vector.load %arg11[%c0_14, %c0_15] : memref<180x24xf32, #tpu.memory_space<vmem>>, vector<16x24xf32>
    %40 = vector.shape_cast %22 : vector<24xf32> to vector<1x24xf32>
    %41 = vector.broadcast %40 : vector<1x24xf32> to vector<16x24xf32>
    %42 = arith.mulf %39, %41 : vector<16x24xf32>
    %c1 = arith.constant 1 : index
    %c0_16 = arith.constant 0 : index
    %43 = vector.load %arg11[%c1, %c0_16] : memref<180x24xf32, #tpu.memory_space<vmem>>, vector<16x24xf32>
    %44 = vector.shape_cast %24 : vector<24xf32> to vector<1x24xf32>
    %45 = vector.broadcast %44 : vector<1x24xf32> to vector<16x24xf32>
    %46 = arith.mulf %43, %45 : vector<16x24xf32>
    %47 = arith.addf %42, %46 : vector<16x24xf32>
    %c2 = arith.constant 2 : index
    %c0_17 = arith.constant 0 : index
    %48 = vector.load %arg11[%c2, %c0_17] : memref<180x24xf32, #tpu.memory_space<vmem>>, vector<16x24xf32>
    %49 = vector.shape_cast %26 : vector<24xf32> to vector<1x24xf32>
    %50 = vector.broadcast %49 : vector<1x24xf32> to vector<16x24xf32>
    %51 = arith.mulf %48, %50 : vector<16x24xf32>
    %52 = arith.addf %47, %51 : vector<16x24xf32>
    %c18 = arith.constant 18 : index
    %c0_18 = arith.constant 0 : index
    %53 = vector.load %arg11[%c18, %c0_18] : memref<180x24xf32, #tpu.memory_space<vmem>>, vector<16x24xf32>
    %54 = vector.shape_cast %28 : vector<24xf32> to vector<1x24xf32>
    %55 = vector.broadcast %54 : vector<1x24xf32> to vector<16x24xf32>
    %56 = arith.mulf %53, %55 : vector<16x24xf32>
    %57 = arith.addf %52, %56 : vector<16x24xf32>
    %c19 = arith.constant 19 : index
    %c0_19 = arith.constant 0 : index
    %58 = vector.load %arg11[%c19, %c0_19] : memref<180x24xf32, #tpu.memory_space<vmem>>, vector<16x24xf32>
    %59 = vector.shape_cast %30 : vector<24xf32> to vector<1x24xf32>
    %60 = vector.broadcast %59 : vector<1x24xf32> to vector<16x24xf32>
    %61 = arith.mulf %58, %60 : vector<16x24xf32>
    %62 = arith.addf %57, %61 : vector<16x24xf32>
    %c20 = arith.constant 20 : index
    %c0_20 = arith.constant 0 : index
    %63 = vector.load %arg11[%c20, %c0_20] : memref<180x24xf32, #tpu.memory_space<vmem>>, vector<16x24xf32>
    %64 = vector.shape_cast %32 : vector<24xf32> to vector<1x24xf32>
    %65 = vector.broadcast %64 : vector<1x24xf32> to vector<16x24xf32>
    %66 = arith.mulf %63, %65 : vector<16x24xf32>
    %67 = arith.addf %62, %66 : vector<16x24xf32>
    %c36 = arith.constant 36 : index
    %c0_21 = arith.constant 0 : index
    %68 = vector.load %arg11[%c36, %c0_21] : memref<180x24xf32, #tpu.memory_space<vmem>>, vector<16x24xf32>
    %69 = vector.shape_cast %34 : vector<24xf32> to vector<1x24xf32>
    %70 = vector.broadcast %69 : vector<1x24xf32> to vector<16x24xf32>
    %71 = arith.mulf %68, %70 : vector<16x24xf32>
    %72 = arith.addf %67, %71 : vector<16x24xf32>
    %c37 = arith.constant 37 : index
    %c0_22 = arith.constant 0 : index
    %73 = vector.load %arg11[%c37, %c0_22] : memref<180x24xf32, #tpu.memory_space<vmem>>, vector<16x24xf32>
    %74 = vector.shape_cast %36 : vector<24xf32> to vector<1x24xf32>
    %75 = vector.broadcast %74 : vector<1x24xf32> to vector<16x24xf32>
    %76 = arith.mulf %73, %75 : vector<16x24xf32>
    %77 = arith.addf %72, %76 : vector<16x24xf32>
    %c38 = arith.constant 38 : index
    %c0_23 = arith.constant 0 : index
    %78 = vector.load %arg11[%c38, %c0_23] : memref<180x24xf32, #tpu.memory_space<vmem>>, vector<16x24xf32>
    %79 = vector.shape_cast %38 : vector<24xf32> to vector<1x24xf32>
    %80 = vector.broadcast %79 : vector<1x24xf32> to vector<16x24xf32>
    %81 = arith.mulf %78, %80 : vector<16x24xf32>
    %82 = arith.addf %77, %81 : vector<16x24xf32>
    %83 = vector.broadcast %20 : vector<1x24xf32> to vector<16x24xf32>
    %84 = arith.addf %82, %83 : vector<16x24xf32>
    %cst_24 = arith.constant 0.000000e+00 : f32
    %cst_25 = arith.constant 6.000000e+00 : f32
    %85 = vector.broadcast %cst_24 : f32 to vector<16x24xf32>
    %86 = arith.maximumf %85, %84 : vector<16x24xf32>
    %87 = vector.broadcast %cst_25 : f32 to vector<16x24xf32>
    %88 = arith.minimumf %87, %86 : vector<16x24xf32>
    %c0_26 = arith.constant 0 : index
    %c0_27 = arith.constant 0 : index
    %89 = vector.load %arg12[%c0_26, %c0_27] : memref<128x24xf32, #tpu.memory_space<vmem>>, vector<16x24xf32>
    tpu.vector_store %arg12[%c0_26, %c0_27], %88 {strides = array<i32>} : memref<128x24xf32, #tpu.memory_space<vmem>>, vector<16x24xf32>,
    %c18_28 = arith.constant 18 : index
    %c0_29 = arith.constant 0 : index
    %90 = vector.load %arg11[%c18_28, %c0_29] : memref<180x24xf32, #tpu.memory_space<vmem>>, vector<16x24xf32>
    %91 = vector.shape_cast %22 : vector<24xf32> to vector<1x24xf32>
    %92 = vector.broadcast %91 : vector<1x24xf32> to vector<16x24xf32>
    %93 = arith.mulf %90, %92 : vector<16x24xf32>
    %c19_30 = arith.constant 19 : index
    %c0_31 = arith.constant 0 : index
    %94 = vector.load %arg11[%c19_30, %c0_31] : memref<180x24xf32, #tpu.memory_space<vmem>>, vector<16x24xf32>
    %95 = vector.shape_cast %24 : vector<24xf32> to vector<1x24xf32>
    %96 = vector.broadcast %95 : vector<1x24xf32> to vector<16x24xf32>
    %97 = arith.mulf %94, %96 : vector<16x24xf32>
    %98 = arith.addf %93, %97 : vector<16x24xf32>
    %c20_32 = arith.constant 20 : index
    %c0_33 = arith.constant 0 : index
    %99 = vector.load %arg11[%c20_32, %c0_33] : memref<180x24xf32, #tpu.memory_space<vmem>>, vector<16x24xf32>
    %100 = vector.shape_cast %26 : vector<24xf32> to vector<1x24xf32>
    %101 = vector.broadcast %100 : vector<1x24xf32> to vector<16x24xf32>
    %102 = arith.mulf %99, %101 : vector<16x24xf32>
    %103 = arith.addf %98, %102 : vector<16x24xf32>
    %c36_34 = arith.constant 36 : index
    %c0_35 = arith.constant 0 : index
    %104 = vector.load %arg11[%c36_34, %c0_35] : memref<180x24xf32, #tpu.memory_space<vmem>>, vector<16x24xf32>
    %105 = vector.shape_cast %28 : vector<24xf32> to vector<1x24xf32>
    %106 = vector.broadcast %105 : vector<1x24xf32> to vector<16x24xf32>
    %107 = arith.mulf %104, %106 : vector<16x24xf32>
    %108 = arith.addf %103, %107 : vector<16x24xf32>
    %c37_36 = arith.constant 37 : index
    %c0_37 = arith.constant 0 : index
    %109 = vector.load %arg11[%c37_36, %c0_37] : memref<180x24xf32, #tpu.memory_space<vmem>>, vector<16x24xf32>
    %110 = vector.shape_cast %30 : vector<24xf32> to vector<1x24xf32>
    %111 = vector.broadcast %110 : vector<1x24xf32> to vector<16x24xf32>
    %112 = arith.mulf %109, %111 : vector<16x24xf32>
    %113 = arith.addf %108, %112 : vector<16x24xf32>
    %c38_38 = arith.constant 38 : index
    %c0_39 = arith.constant 0 : index
    %114 = vector.load %arg11[%c38_38, %c0_39] : memref<180x24xf32, #tpu.memory_space<vmem>>, vector<16x24xf32>
    %115 = vector.shape_cast %32 : vector<24xf32> to vector<1x24xf32>
    %116 = vector.broadcast %115 : vector<1x24xf32> to vector<16x24xf32>
    %117 = arith.mulf %114, %116 : vector<16x24xf32>
    %118 = arith.addf %113, %117 : vector<16x24xf32>
    %c54 = arith.constant 54 : index
    %c0_40 = arith.constant 0 : index
    %119 = vector.load %arg11[%c54, %c0_40] : memref<180x24xf32, #tpu.memory_space<vmem>>, vector<16x24xf32>
    %120 = vector.shape_cast %34 : vector<24xf32> to vector<1x24xf32>
    %121 = vector.broadcast %120 : vector<1x24xf32> to vector<16x24xf32>
    %122 = arith.mulf %119, %121 : vector<16x24xf32>
    %123 = arith.addf %118, %122 : vector<16x24xf32>
    %c55 = arith.constant 55 : index
    %c0_41 = arith.constant 0 : index
    %124 = vector.load %arg11[%c55, %c0_41] : memref<180x24xf32, #tpu.memory_space<vmem>>, vector<16x24xf32>
    %125 = vector.shape_cast %36 : vector<24xf32> to vector<1x24xf32>
    %126 = vector.broadcast %125 : vector<1x24xf32> to vector<16x24xf32>
    %127 = arith.mulf %124, %126 : vector<16x24xf32>
    %128 = arith.addf %123, %127 : vector<16x24xf32>
    %c56 = arith.constant 56 : index
    %c0_42 = arith.constant 0 : index
    %129 = vector.load %arg11[%c56, %c0_42] : memref<180x24xf32, #tpu.memory_space<vmem>>, vector<16x24xf32>
    %130 = vector.shape_cast %38 : vector<24xf32> to vector<1x24xf32>
    %131 = vector.broadcast %130 : vector<1x24xf32> to vector<16x24xf32>
    %132 = arith.mulf %129, %131 : vector<16x24xf32>
    %133 = arith.addf %128, %132 : vector<16x24xf32>
    %134 = vector.broadcast %20 : vector<1x24xf32> to vector<16x24xf32>
    %135 = arith.addf %133, %134 : vector<16x24xf32>
    %cst_43 = arith.constant 0.000000e+00 : f32
    %cst_44 = arith.constant 6.000000e+00 : f32
    %136 = vector.broadcast %cst_43 : f32 to vector<16x24xf32>
    %137 = arith.maximumf %136, %135 : vector<16x24xf32>
    %138 = vector.broadcast %cst_44 : f32 to vector<16x24xf32>
    %139 = arith.minimumf %138, %137 : vector<16x24xf32>
    %c16 = arith.constant 16 : index
    %c0_45 = arith.constant 0 : index
    %140 = vector.load %arg12[%c16, %c0_45] : memref<128x24xf32, #tpu.memory_space<vmem>>, vector<16x24xf32>
    tpu.vector_store %arg12[%c16, %c0_45], %139 {strides = array<i32>} : memref<128x24xf32, #tpu.memory_space<vmem>>, vector<16x24xf32>,
    %c36_46 = arith.constant 36 : index
    %c0_47 = arith.constant 0 : index
    %141 = vector.load %arg11[%c36_46, %c0_47] : memref<180x24xf32, #tpu.memory_space<vmem>>, vector<16x24xf32>
    %142 = vector.shape_cast %22 : vector<24xf32> to vector<1x24xf32>
    %143 = vector.broadcast %142 : vector<1x24xf32> to vector<16x24xf32>
    %144 = arith.mulf %141, %143 : vector<16x24xf32>
    %c37_48 = arith.constant 37 : index
    %c0_49 = arith.constant 0 : index
    %145 = vector.load %arg11[%c37_48, %c0_49] : memref<180x24xf32, #tpu.memory_space<vmem>>, vector<16x24xf32>
    %146 = vector.shape_cast %24 : vector<24xf32> to vector<1x24xf32>
    %147 = vector.broadcast %146 : vector<1x24xf32> to vector<16x24xf32>
    %148 = arith.mulf %145, %147 : vector<16x24xf32>
    %149 = arith.addf %144, %148 : vector<16x24xf32>
    %c38_50 = arith.constant 38 : index
    %c0_51 = arith.constant 0 : index
    %150 = vector.load %arg11[%c38_50, %c0_51] : memref<180x24xf32, #tpu.memory_space<vmem>>, vector<16x24xf32>
    %151 = vector.shape_cast %26 : vector<24xf32> to vector<1x24xf32>
    %152 = vector.broadcast %151 : vector<1x24xf32> to vector<16x24xf32>
    %153 = arith.mulf %150, %152 : vector<16x24xf32>
    %154 = arith.addf %149, %153 : vector<16x24xf32>
    %c54_52 = arith.constant 54 : index
    %c0_53 = arith.constant 0 : index
    %155 = vector.load %arg11[%c54_52, %c0_53] : memref<180x24xf32, #tpu.memory_space<vmem>>, vector<16x24xf32>
    %156 = vector.shape_cast %28 : vector<24xf32> to vector<1x24xf32>
    %157 = vector.broadcast %156 : vector<1x24xf32> to vector<16x24xf32>
    %158 = arith.mulf %155, %157 : vector<16x24xf32>
    %159 = arith.addf %154, %158 : vector<16x24xf32>
    %c55_54 = arith.constant 55 : index
    %c0_55 = arith.constant 0 : index
    %160 = vector.load %arg11[%c55_54, %c0_55] : memref<180x24xf32, #tpu.memory_space<vmem>>, vector<16x24xf32>
    %161 = vector.shape_cast %30 : vector<24xf32> to vector<1x24xf32>
    %162 = vector.broadcast %161 : vector<1x24xf32> to vector<16x24xf32>
    %163 = arith.mulf %160, %162 : vector<16x24xf32>
    %164 = arith.addf %159, %163 : vector<16x24xf32>
    %c56_56 = arith.constant 56 : index
    %c0_57 = arith.constant 0 : index
    %165 = vector.load %arg11[%c56_56, %c0_57] : memref<180x24xf32, #tpu.memory_space<vmem>>, vector<16x24xf32>
    %166 = vector.shape_cast %32 : vector<24xf32> to vector<1x24xf32>
    %167 = vector.broadcast %166 : vector<1x24xf32> to vector<16x24xf32>
    %168 = arith.mulf %165, %167 : vector<16x24xf32>
    %169 = arith.addf %164, %168 : vector<16x24xf32>
    %c72 = arith.constant 72 : index
    %c0_58 = arith.constant 0 : index
    %170 = vector.load %arg11[%c72, %c0_58] : memref<180x24xf32, #tpu.memory_space<vmem>>, vector<16x24xf32>
    %171 = vector.shape_cast %34 : vector<24xf32> to vector<1x24xf32>
    %172 = vector.broadcast %171 : vector<1x24xf32> to vector<16x24xf32>
    %173 = arith.mulf %170, %172 : vector<16x24xf32>
    %174 = arith.addf %169, %173 : vector<16x24xf32>
    %c73 = arith.constant 73 : index
    %c0_59 = arith.constant 0 : index
    %175 = vector.load %arg11[%c73, %c0_59] : memref<180x24xf32, #tpu.memory_space<vmem>>, vector<16x24xf32>
    %176 = vector.shape_cast %36 : vector<24xf32> to vector<1x24xf32>
    %177 = vector.broadcast %176 : vector<1x24xf32> to vector<16x24xf32>
    %178 = arith.mulf %175, %177 : vector<16x24xf32>
    %179 = arith.addf %174, %178 : vector<16x24xf32>
    %c74 = arith.constant 74 : index
    %c0_60 = arith.constant 0 : index
    %180 = vector.load %arg11[%c74, %c0_60] : memref<180x24xf32, #tpu.memory_space<vmem>>, vector<16x24xf32>
    %181 = vector.shape_cast %38 : vector<24xf32> to vector<1x24xf32>
    %182 = vector.broadcast %181 : vector<1x24xf32> to vector<16x24xf32>
    %183 = arith.mulf %180, %182 : vector<16x24xf32>
    %184 = arith.addf %179, %183 : vector<16x24xf32>
    %185 = vector.broadcast %20 : vector<1x24xf32> to vector<16x24xf32>
    %186 = arith.addf %184, %185 : vector<16x24xf32>
    %cst_61 = arith.constant 0.000000e+00 : f32
    %cst_62 = arith.constant 6.000000e+00 : f32
    %187 = vector.broadcast %cst_61 : f32 to vector<16x24xf32>
    %188 = arith.maximumf %187, %186 : vector<16x24xf32>
    %189 = vector.broadcast %cst_62 : f32 to vector<16x24xf32>
    %190 = arith.minimumf %189, %188 : vector<16x24xf32>
    %c32 = arith.constant 32 : index
    %c0_63 = arith.constant 0 : index
    %191 = vector.load %arg12[%c32, %c0_63] : memref<128x24xf32, #tpu.memory_space<vmem>>, vector<16x24xf32>
    tpu.vector_store %arg12[%c32, %c0_63], %190 {strides = array<i32>} : memref<128x24xf32, #tpu.memory_space<vmem>>, vector<16x24xf32>,
    %c54_64 = arith.constant 54 : index
    %c0_65 = arith.constant 0 : index
    %192 = vector.load %arg11[%c54_64, %c0_65] : memref<180x24xf32, #tpu.memory_space<vmem>>, vector<16x24xf32>
    %193 = vector.shape_cast %22 : vector<24xf32> to vector<1x24xf32>
    %194 = vector.broadcast %193 : vector<1x24xf32> to vector<16x24xf32>
    %195 = arith.mulf %192, %194 : vector<16x24xf32>
    %c55_66 = arith.constant 55 : index
    %c0_67 = arith.constant 0 : index
    %196 = vector.load %arg11[%c55_66, %c0_67] : memref<180x24xf32, #tpu.memory_space<vmem>>, vector<16x24xf32>
    %197 = vector.shape_cast %24 : vector<24xf32> to vector<1x24xf32>
    %198 = vector.broadcast %197 : vector<1x24xf32> to vector<16x24xf32>
    %199 = arith.mulf %196, %198 : vector<16x24xf32>
    %200 = arith.addf %195, %199 : vector<16x24xf32>
    %c56_68 = arith.constant 56 : index
    %c0_69 = arith.constant 0 : index
    %201 = vector.load %arg11[%c56_68, %c0_69] : memref<180x24xf32, #tpu.memory_space<vmem>>, vector<16x24xf32>
    %202 = vector.shape_cast %26 : vector<24xf32> to vector<1x24xf32>
    %203 = vector.broadcast %202 : vector<1x24xf32> to vector<16x24xf32>
    %204 = arith.mulf %201, %203 : vector<16x24xf32>
    %205 = arith.addf %200, %204 : vector<16x24xf32>
    %c72_70 = arith.constant 72 : index
    %c0_71 = arith.constant 0 : index
    %206 = vector.load %arg11[%c72_70, %c0_71] : memref<180x24xf32, #tpu.memory_space<vmem>>, vector<16x24xf32>
    %207 = vector.shape_cast %28 : vector<24xf32> to vector<1x24xf32>
    %208 = vector.broadcast %207 : vector<1x24xf32> to vector<16x24xf32>
    %209 = arith.mulf %206, %208 : vector<16x24xf32>
    %210 = arith.addf %205, %209 : vector<16x24xf32>
    %c73_72 = arith.constant 73 : index
    %c0_73 = arith.constant 0 : index
    %211 = vector.load %arg11[%c73_72, %c0_73] : memref<180x24xf32, #tpu.memory_space<vmem>>, vector<16x24xf32>
    %212 = vector.shape_cast %30 : vector<24xf32> to vector<1x24xf32>
    %213 = vector.broadcast %212 : vector<1x24xf32> to vector<16x24xf32>
    %214 = arith.mulf %211, %213 : vector<16x24xf32>
    %215 = arith.addf %210, %214 : vector<16x24xf32>
    %c74_74 = arith.constant 74 : index
    %c0_75 = arith.constant 0 : index
    %216 = vector.load %arg11[%c74_74, %c0_75] : memref<180x24xf32, #tpu.memory_space<vmem>>, vector<16x24xf32>
    %217 = vector.shape_cast %32 : vector<24xf32> to vector<1x24xf32>
    %218 = vector.broadcast %217 : vector<1x24xf32> to vector<16x24xf32>
    %219 = arith.mulf %216, %218 : vector<16x24xf32>
    %220 = arith.addf %215, %219 : vector<16x24xf32>
    %c90 = arith.constant 90 : index
    %c0_76 = arith.constant 0 : index
    %221 = vector.load %arg11[%c90, %c0_76] : memref<180x24xf32, #tpu.memory_space<vmem>>, vector<16x24xf32>
    %222 = vector.shape_cast %34 : vector<24xf32> to vector<1x24xf32>
    %223 = vector.broadcast %222 : vector<1x24xf32> to vector<16x24xf32>
    %224 = arith.mulf %221, %223 : vector<16x24xf32>
    %225 = arith.addf %220, %224 : vector<16x24xf32>
    %c91 = arith.constant 91 : index
    %c0_77 = arith.constant 0 : index
    %226 = vector.load %arg11[%c91, %c0_77] : memref<180x24xf32, #tpu.memory_space<vmem>>, vector<16x24xf32>
    %227 = vector.shape_cast %36 : vector<24xf32> to vector<1x24xf32>
    %228 = vector.broadcast %227 : vector<1x24xf32> to vector<16x24xf32>
    %229 = arith.mulf %226, %228 : vector<16x24xf32>
    %230 = arith.addf %225, %229 : vector<16x24xf32>
    %c92 = arith.constant 92 : index
    %c0_78 = arith.constant 0 : index
    %231 = vector.load %arg11[%c92, %c0_78] : memref<180x24xf32, #tpu.memory_space<vmem>>, vector<16x24xf32>
    %232 = vector.shape_cast %38 : vector<24xf32> to vector<1x24xf32>
    %233 = vector.broadcast %232 : vector<1x24xf32> to vector<16x24xf32>
    %234 = arith.mulf %231, %233 : vector<16x24xf32>
    %235 = arith.addf %230, %234 : vector<16x24xf32>
    %236 = vector.broadcast %20 : vector<1x24xf32> to vector<16x24xf32>
    %237 = arith.addf %235, %236 : vector<16x24xf32>
    %cst_79 = arith.constant 0.000000e+00 : f32
    %cst_80 = arith.constant 6.000000e+00 : f32
    %238 = vector.broadcast %cst_79 : f32 to vector<16x24xf32>
    %239 = arith.maximumf %238, %237 : vector<16x24xf32>
    %240 = vector.broadcast %cst_80 : f32 to vector<16x24xf32>
    %241 = arith.minimumf %240, %239 : vector<16x24xf32>
    %c48 = arith.constant 48 : index
    %c0_81 = arith.constant 0 : index
    %242 = vector.load %arg12[%c48, %c0_81] : memref<128x24xf32, #tpu.memory_space<vmem>>, vector<16x24xf32>
    tpu.vector_store %arg12[%c48, %c0_81], %241 {strides = array<i32>} : memref<128x24xf32, #tpu.memory_space<vmem>>, vector<16x24xf32>,
    %c72_82 = arith.constant 72 : index
    %c0_83 = arith.constant 0 : index
    %243 = vector.load %arg11[%c72_82, %c0_83] : memref<180x24xf32, #tpu.memory_space<vmem>>, vector<16x24xf32>
    %244 = vector.shape_cast %22 : vector<24xf32> to vector<1x24xf32>
    %245 = vector.broadcast %244 : vector<1x24xf32> to vector<16x24xf32>
    %246 = arith.mulf %243, %245 : vector<16x24xf32>
    %c73_84 = arith.constant 73 : index
    %c0_85 = arith.constant 0 : index
    %247 = vector.load %arg11[%c73_84, %c0_85] : memref<180x24xf32, #tpu.memory_space<vmem>>, vector<16x24xf32>
    %248 = vector.shape_cast %24 : vector<24xf32> to vector<1x24xf32>
    %249 = vector.broadcast %248 : vector<1x24xf32> to vector<16x24xf32>
    %250 = arith.mulf %247, %249 : vector<16x24xf32>
    %251 = arith.addf %246, %250 : vector<16x24xf32>
    %c74_86 = arith.constant 74 : index
    %c0_87 = arith.constant 0 : index
    %252 = vector.load %arg11[%c74_86, %c0_87] : memref<180x24xf32, #tpu.memory_space<vmem>>, vector<16x24xf32>
    %253 = vector.shape_cast %26 : vector<24xf32> to vector<1x24xf32>
    %254 = vector.broadcast %253 : vector<1x24xf32> to vector<16x24xf32>
    %255 = arith.mulf %252, %254 : vector<16x24xf32>
    %256 = arith.addf %251, %255 : vector<16x24xf32>
    %c90_88 = arith.constant 90 : index
    %c0_89 = arith.constant 0 : index
    %257 = vector.load %arg11[%c90_88, %c0_89] : memref<180x24xf32, #tpu.memory_space<vmem>>, vector<16x24xf32>
    %258 = vector.shape_cast %28 : vector<24xf32> to vector<1x24xf32>
    %259 = vector.broadcast %258 : vector<1x24xf32> to vector<16x24xf32>
    %260 = arith.mulf %257, %259 : vector<16x24xf32>
    %261 = arith.addf %256, %260 : vector<16x24xf32>
    %c91_90 = arith.constant 91 : index
    %c0_91 = arith.constant 0 : index
    %262 = vector.load %arg11[%c91_90, %c0_91] : memref<180x24xf32, #tpu.memory_space<vmem>>, vector<16x24xf32>
    %263 = vector.shape_cast %30 : vector<24xf32> to vector<1x24xf32>
    %264 = vector.broadcast %263 : vector<1x24xf32> to vector<16x24xf32>
    %265 = arith.mulf %262, %264 : vector<16x24xf32>
    %266 = arith.addf %261, %265 : vector<16x24xf32>
    %c92_92 = arith.constant 92 : index
    %c0_93 = arith.constant 0 : index
    %267 = vector.load %arg11[%c92_92, %c0_93] : memref<180x24xf32, #tpu.memory_space<vmem>>, vector<16x24xf32>
    %268 = vector.shape_cast %32 : vector<24xf32> to vector<1x24xf32>
    %269 = vector.broadcast %268 : vector<1x24xf32> to vector<16x24xf32>
    %270 = arith.mulf %267, %269 : vector<16x24xf32>
    %271 = arith.addf %266, %270 : vector<16x24xf32>
    %c108 = arith.constant 108 : index
    %c0_94 = arith.constant 0 : index
    %272 = vector.load %arg11[%c108, %c0_94] : memref<180x24xf32, #tpu.memory_space<vmem>>, vector<16x24xf32>
    %273 = vector.shape_cast %34 : vector<24xf32> to vector<1x24xf32>
    %274 = vector.broadcast %273 : vector<1x24xf32> to vector<16x24xf32>
    %275 = arith.mulf %272, %274 : vector<16x24xf32>
    %276 = arith.addf %271, %275 : vector<16x24xf32>
    %c109 = arith.constant 109 : index
    %c0_95 = arith.constant 0 : index
    %277 = vector.load %arg11[%c109, %c0_95] : memref<180x24xf32, #tpu.memory_space<vmem>>, vector<16x24xf32>
    %278 = vector.shape_cast %36 : vector<24xf32> to vector<1x24xf32>
    %279 = vector.broadcast %278 : vector<1x24xf32> to vector<16x24xf32>
    %280 = arith.mulf %277, %279 : vector<16x24xf32>
    %281 = arith.addf %276, %280 : vector<16x24xf32>
    %c110 = arith.constant 110 : index
    %c0_96 = arith.constant 0 : index
    %282 = vector.load %arg11[%c110, %c0_96] : memref<180x24xf32, #tpu.memory_space<vmem>>, vector<16x24xf32>
    %283 = vector.shape_cast %38 : vector<24xf32> to vector<1x24xf32>
    %284 = vector.broadcast %283 : vector<1x24xf32> to vector<16x24xf32>
    %285 = arith.mulf %282, %284 : vector<16x24xf32>
    %286 = arith.addf %281, %285 : vector<16x24xf32>
    %287 = vector.broadcast %20 : vector<1x24xf32> to vector<16x24xf32>
    %288 = arith.addf %286, %287 : vector<16x24xf32>
    %cst_97 = arith.constant 0.000000e+00 : f32
    %cst_98 = arith.constant 6.000000e+00 : f32
    %289 = vector.broadcast %cst_97 : f32 to vector<16x24xf32>
    %290 = arith.maximumf %289, %288 : vector<16x24xf32>
    %291 = vector.broadcast %cst_98 : f32 to vector<16x24xf32>
    %292 = arith.minimumf %291, %290 : vector<16x24xf32>
    %c64 = arith.constant 64 : index
    %c0_99 = arith.constant 0 : index
    %293 = vector.load %arg12[%c64, %c0_99] : memref<128x24xf32, #tpu.memory_space<vmem>>, vector<16x24xf32>
    tpu.vector_store %arg12[%c64, %c0_99], %292 {strides = array<i32>} : memref<128x24xf32, #tpu.memory_space<vmem>>, vector<16x24xf32>,
    %c90_100 = arith.constant 90 : index
    %c0_101 = arith.constant 0 : index
    %294 = vector.load %arg11[%c90_100, %c0_101] : memref<180x24xf32, #tpu.memory_space<vmem>>, vector<16x24xf32>
    %295 = vector.shape_cast %22 : vector<24xf32> to vector<1x24xf32>
    %296 = vector.broadcast %295 : vector<1x24xf32> to vector<16x24xf32>
    %297 = arith.mulf %294, %296 : vector<16x24xf32>
    %c91_102 = arith.constant 91 : index
    %c0_103 = arith.constant 0 : index
    %298 = vector.load %arg11[%c91_102, %c0_103] : memref<180x24xf32, #tpu.memory_space<vmem>>, vector<16x24xf32>
    %299 = vector.shape_cast %24 : vector<24xf32> to vector<1x24xf32>
    %300 = vector.broadcast %299 : vector<1x24xf32> to vector<16x24xf32>
    %301 = arith.mulf %298, %300 : vector<16x24xf32>
    %302 = arith.addf %297, %301 : vector<16x24xf32>
    %c92_104 = arith.constant 92 : index
    %c0_105 = arith.constant 0 : index
    %303 = vector.load %arg11[%c92_104, %c0_105] : memref<180x24xf32, #tpu.memory_space<vmem>>, vector<16x24xf32>
    %304 = vector.shape_cast %26 : vector<24xf32> to vector<1x24xf32>
    %305 = vector.broadcast %304 : vector<1x24xf32> to vector<16x24xf32>
    %306 = arith.mulf %303, %305 : vector<16x24xf32>
    %307 = arith.addf %302, %306 : vector<16x24xf32>
    %c108_106 = arith.constant 108 : index
    %c0_107 = arith.constant 0 : index
    %308 = vector.load %arg11[%c108_106, %c0_107] : memref<180x24xf32, #tpu.memory_space<vmem>>, vector<16x24xf32>
    %309 = vector.shape_cast %28 : vector<24xf32> to vector<1x24xf32>
    %310 = vector.broadcast %309 : vector<1x24xf32> to vector<16x24xf32>
    %311 = arith.mulf %308, %310 : vector<16x24xf32>
    %312 = arith.addf %307, %311 : vector<16x24xf32>
    %c109_108 = arith.constant 109 : index
    %c0_109 = arith.constant 0 : index
    %313 = vector.load %arg11[%c109_108, %c0_109] : memref<180x24xf32, #tpu.memory_space<vmem>>, vector<16x24xf32>
    %314 = vector.shape_cast %30 : vector<24xf32> to vector<1x24xf32>
    %315 = vector.broadcast %314 : vector<1x24xf32> to vector<16x24xf32>
    %316 = arith.mulf %313, %315 : vector<16x24xf32>
    %317 = arith.addf %312, %316 : vector<16x24xf32>
    %c110_110 = arith.constant 110 : index
    %c0_111 = arith.constant 0 : index
    %318 = vector.load %arg11[%c110_110, %c0_111] : memref<180x24xf32, #tpu.memory_space<vmem>>, vector<16x24xf32>
    %319 = vector.shape_cast %32 : vector<24xf32> to vector<1x24xf32>
    %320 = vector.broadcast %319 : vector<1x24xf32> to vector<16x24xf32>
    %321 = arith.mulf %318, %320 : vector<16x24xf32>
    %322 = arith.addf %317, %321 : vector<16x24xf32>
    %c126 = arith.constant 126 : index
    %c0_112 = arith.constant 0 : index
    %323 = vector.load %arg11[%c126, %c0_112] : memref<180x24xf32, #tpu.memory_space<vmem>>, vector<16x24xf32>
    %324 = vector.shape_cast %34 : vector<24xf32> to vector<1x24xf32>
    %325 = vector.broadcast %324 : vector<1x24xf32> to vector<16x24xf32>
    %326 = arith.mulf %323, %325 : vector<16x24xf32>
    %327 = arith.addf %322, %326 : vector<16x24xf32>
    %c127 = arith.constant 127 : index
    %c0_113 = arith.constant 0 : index
    %328 = vector.load %arg11[%c127, %c0_113] : memref<180x24xf32, #tpu.memory_space<vmem>>, vector<16x24xf32>
    %329 = vector.shape_cast %36 : vector<24xf32> to vector<1x24xf32>
    %330 = vector.broadcast %329 : vector<1x24xf32> to vector<16x24xf32>
    %331 = arith.mulf %328, %330 : vector<16x24xf32>
    %332 = arith.addf %327, %331 : vector<16x24xf32>
    %c128 = arith.constant 128 : index
    %c0_114 = arith.constant 0 : index
    %333 = vector.load %arg11[%c128, %c0_114] : memref<180x24xf32, #tpu.memory_space<vmem>>, vector<16x24xf32>
    %334 = vector.shape_cast %38 : vector<24xf32> to vector<1x24xf32>
    %335 = vector.broadcast %334 : vector<1x24xf32> to vector<16x24xf32>
    %336 = arith.mulf %333, %335 : vector<16x24xf32>
    %337 = arith.addf %332, %336 : vector<16x24xf32>
    %338 = vector.broadcast %20 : vector<1x24xf32> to vector<16x24xf32>
    %339 = arith.addf %337, %338 : vector<16x24xf32>
    %cst_115 = arith.constant 0.000000e+00 : f32
    %cst_116 = arith.constant 6.000000e+00 : f32
    %340 = vector.broadcast %cst_115 : f32 to vector<16x24xf32>
    %341 = arith.maximumf %340, %339 : vector<16x24xf32>
    %342 = vector.broadcast %cst_116 : f32 to vector<16x24xf32>
    %343 = arith.minimumf %342, %341 : vector<16x24xf32>
    %c80 = arith.constant 80 : index
    %c0_117 = arith.constant 0 : index
    %344 = vector.load %arg12[%c80, %c0_117] : memref<128x24xf32, #tpu.memory_space<vmem>>, vector<16x24xf32>
    tpu.vector_store %arg12[%c80, %c0_117], %343 {strides = array<i32>} : memref<128x24xf32, #tpu.memory_space<vmem>>, vector<16x24xf32>,
    %c108_118 = arith.constant 108 : index
    %c0_119 = arith.constant 0 : index
    %345 = vector.load %arg11[%c108_118, %c0_119] : memref<180x24xf32, #tpu.memory_space<vmem>>, vector<16x24xf32>
    %346 = vector.shape_cast %22 : vector<24xf32> to vector<1x24xf32>
    %347 = vector.broadcast %346 : vector<1x24xf32> to vector<16x24xf32>
    %348 = arith.mulf %345, %347 : vector<16x24xf32>
    %c109_120 = arith.constant 109 : index
    %c0_121 = arith.constant 0 : index
    %349 = vector.load %arg11[%c109_120, %c0_121] : memref<180x24xf32, #tpu.memory_space<vmem>>, vector<16x24xf32>
    %350 = vector.shape_cast %24 : vector<24xf32> to vector<1x24xf32>
    %351 = vector.broadcast %350 : vector<1x24xf32> to vector<16x24xf32>
    %352 = arith.mulf %349, %351 : vector<16x24xf32>
    %353 = arith.addf %348, %352 : vector<16x24xf32>
    %c110_122 = arith.constant 110 : index
    %c0_123 = arith.constant 0 : index
    %354 = vector.load %arg11[%c110_122, %c0_123] : memref<180x24xf32, #tpu.memory_space<vmem>>, vector<16x24xf32>
    %355 = vector.shape_cast %26 : vector<24xf32> to vector<1x24xf32>
    %356 = vector.broadcast %355 : vector<1x24xf32> to vector<16x24xf32>
    %357 = arith.mulf %354, %356 : vector<16x24xf32>
    %358 = arith.addf %353, %357 : vector<16x24xf32>
    %c126_124 = arith.constant 126 : index
    %c0_125 = arith.constant 0 : index
    %359 = vector.load %arg11[%c126_124, %c0_125] : memref<180x24xf32, #tpu.memory_space<vmem>>, vector<16x24xf32>
    %360 = vector.shape_cast %28 : vector<24xf32> to vector<1x24xf32>
    %361 = vector.broadcast %360 : vector<1x24xf32> to vector<16x24xf32>
    %362 = arith.mulf %359, %361 : vector<16x24xf32>
    %363 = arith.addf %358, %362 : vector<16x24xf32>
    %c127_126 = arith.constant 127 : index
    %c0_127 = arith.constant 0 : index
    %364 = vector.load %arg11[%c127_126, %c0_127] : memref<180x24xf32, #tpu.memory_space<vmem>>, vector<16x24xf32>
    %365 = vector.shape_cast %30 : vector<24xf32> to vector<1x24xf32>
    %366 = vector.broadcast %365 : vector<1x24xf32> to vector<16x24xf32>
    %367 = arith.mulf %364, %366 : vector<16x24xf32>
    %368 = arith.addf %363, %367 : vector<16x24xf32>
    %c128_128 = arith.constant 128 : index
    %c0_129 = arith.constant 0 : index
    %369 = vector.load %arg11[%c128_128, %c0_129] : memref<180x24xf32, #tpu.memory_space<vmem>>, vector<16x24xf32>
    %370 = vector.shape_cast %32 : vector<24xf32> to vector<1x24xf32>
    %371 = vector.broadcast %370 : vector<1x24xf32> to vector<16x24xf32>
    %372 = arith.mulf %369, %371 : vector<16x24xf32>
    %373 = arith.addf %368, %372 : vector<16x24xf32>
    %c144 = arith.constant 144 : index
    %c0_130 = arith.constant 0 : index
    %374 = vector.load %arg11[%c144, %c0_130] : memref<180x24xf32, #tpu.memory_space<vmem>>, vector<16x24xf32>
    %375 = vector.shape_cast %34 : vector<24xf32> to vector<1x24xf32>
    %376 = vector.broadcast %375 : vector<1x24xf32> to vector<16x24xf32>
    %377 = arith.mulf %374, %376 : vector<16x24xf32>
    %378 = arith.addf %373, %377 : vector<16x24xf32>
    %c145 = arith.constant 145 : index
    %c0_131 = arith.constant 0 : index
    %379 = vector.load %arg11[%c145, %c0_131] : memref<180x24xf32, #tpu.memory_space<vmem>>, vector<16x24xf32>
    %380 = vector.shape_cast %36 : vector<24xf32> to vector<1x24xf32>
    %381 = vector.broadcast %380 : vector<1x24xf32> to vector<16x24xf32>
    %382 = arith.mulf %379, %381 : vector<16x24xf32>
    %383 = arith.addf %378, %382 : vector<16x24xf32>
    %c146 = arith.constant 146 : index
    %c0_132 = arith.constant 0 : index
    %384 = vector.load %arg11[%c146, %c0_132] : memref<180x24xf32, #tpu.memory_space<vmem>>, vector<16x24xf32>
    %385 = vector.shape_cast %38 : vector<24xf32> to vector<1x24xf32>
    %386 = vector.broadcast %385 : vector<1x24xf32> to vector<16x24xf32>
    %387 = arith.mulf %384, %386 : vector<16x24xf32>
    %388 = arith.addf %383, %387 : vector<16x24xf32>
    %389 = vector.broadcast %20 : vector<1x24xf32> to vector<16x24xf32>
    %390 = arith.addf %388, %389 : vector<16x24xf32>
    %cst_133 = arith.constant 0.000000e+00 : f32
    %cst_134 = arith.constant 6.000000e+00 : f32
    %391 = vector.broadcast %cst_133 : f32 to vector<16x24xf32>
    %392 = arith.maximumf %391, %390 : vector<16x24xf32>
    %393 = vector.broadcast %cst_134 : f32 to vector<16x24xf32>
    %394 = arith.minimumf %393, %392 : vector<16x24xf32>
    %c96 = arith.constant 96 : index
    %c0_135 = arith.constant 0 : index
    %395 = vector.load %arg12[%c96, %c0_135] : memref<128x24xf32, #tpu.memory_space<vmem>>, vector<16x24xf32>
    tpu.vector_store %arg12[%c96, %c0_135], %394 {strides = array<i32>} : memref<128x24xf32, #tpu.memory_space<vmem>>, vector<16x24xf32>,
    %c126_136 = arith.constant 126 : index
    %c0_137 = arith.constant 0 : index
    %396 = vector.load %arg11[%c126_136, %c0_137] : memref<180x24xf32, #tpu.memory_space<vmem>>, vector<16x24xf32>
    %397 = vector.shape_cast %22 : vector<24xf32> to vector<1x24xf32>
    %398 = vector.broadcast %397 : vector<1x24xf32> to vector<16x24xf32>
    %399 = arith.mulf %396, %398 : vector<16x24xf32>
    %c127_138 = arith.constant 127 : index
    %c0_139 = arith.constant 0 : index
    %400 = vector.load %arg11[%c127_138, %c0_139] : memref<180x24xf32, #tpu.memory_space<vmem>>, vector<16x24xf32>
    %401 = vector.shape_cast %24 : vector<24xf32> to vector<1x24xf32>
    %402 = vector.broadcast %401 : vector<1x24xf32> to vector<16x24xf32>
    %403 = arith.mulf %400, %402 : vector<16x24xf32>
    %404 = arith.addf %399, %403 : vector<16x24xf32>
    %c128_140 = arith.constant 128 : index
    %c0_141 = arith.constant 0 : index
    %405 = vector.load %arg11[%c128_140, %c0_141] : memref<180x24xf32, #tpu.memory_space<vmem>>, vector<16x24xf32>
    %406 = vector.shape_cast %26 : vector<24xf32> to vector<1x24xf32>
    %407 = vector.broadcast %406 : vector<1x24xf32> to vector<16x24xf32>
    %408 = arith.mulf %405, %407 : vector<16x24xf32>
    %409 = arith.addf %404, %408 : vector<16x24xf32>
    %c144_142 = arith.constant 144 : index
    %c0_143 = arith.constant 0 : index
    %410 = vector.load %arg11[%c144_142, %c0_143] : memref<180x24xf32, #tpu.memory_space<vmem>>, vector<16x24xf32>
    %411 = vector.shape_cast %28 : vector<24xf32> to vector<1x24xf32>
    %412 = vector.broadcast %411 : vector<1x24xf32> to vector<16x24xf32>
    %413 = arith.mulf %410, %412 : vector<16x24xf32>
    %414 = arith.addf %409, %413 : vector<16x24xf32>
    %c145_144 = arith.constant 145 : index
    %c0_145 = arith.constant 0 : index
    %415 = vector.load %arg11[%c145_144, %c0_145] : memref<180x24xf32, #tpu.memory_space<vmem>>, vector<16x24xf32>
    %416 = vector.shape_cast %30 : vector<24xf32> to vector<1x24xf32>
    %417 = vector.broadcast %416 : vector<1x24xf32> to vector<16x24xf32>
    %418 = arith.mulf %415, %417 : vector<16x24xf32>
    %419 = arith.addf %414, %418 : vector<16x24xf32>
    %c146_146 = arith.constant 146 : index
    %c0_147 = arith.constant 0 : index
    %420 = vector.load %arg11[%c146_146, %c0_147] : memref<180x24xf32, #tpu.memory_space<vmem>>, vector<16x24xf32>
    %421 = vector.shape_cast %32 : vector<24xf32> to vector<1x24xf32>
    %422 = vector.broadcast %421 : vector<1x24xf32> to vector<16x24xf32>
    %423 = arith.mulf %420, %422 : vector<16x24xf32>
    %424 = arith.addf %419, %423 : vector<16x24xf32>
    %c162 = arith.constant 162 : index
    %c0_148 = arith.constant 0 : index
    %425 = vector.load %arg11[%c162, %c0_148] : memref<180x24xf32, #tpu.memory_space<vmem>>, vector<16x24xf32>
    %426 = vector.shape_cast %34 : vector<24xf32> to vector<1x24xf32>
    %427 = vector.broadcast %426 : vector<1x24xf32> to vector<16x24xf32>
    %428 = arith.mulf %425, %427 : vector<16x24xf32>
    %429 = arith.addf %424, %428 : vector<16x24xf32>
    %c163 = arith.constant 163 : index
    %c0_149 = arith.constant 0 : index
    %430 = vector.load %arg11[%c163, %c0_149] : memref<180x24xf32, #tpu.memory_space<vmem>>, vector<16x24xf32>
    %431 = vector.shape_cast %36 : vector<24xf32> to vector<1x24xf32>
    %432 = vector.broadcast %431 : vector<1x24xf32> to vector<16x24xf32>
    %433 = arith.mulf %430, %432 : vector<16x24xf32>
    %434 = arith.addf %429, %433 : vector<16x24xf32>
    %c164 = arith.constant 164 : index
    %c0_150 = arith.constant 0 : index
    %435 = vector.load %arg11[%c164, %c0_150] : memref<180x24xf32, #tpu.memory_space<vmem>>, vector<16x24xf32>
    %436 = vector.shape_cast %38 : vector<24xf32> to vector<1x24xf32>
    %437 = vector.broadcast %436 : vector<1x24xf32> to vector<16x24xf32>
    %438 = arith.mulf %435, %437 : vector<16x24xf32>
    %439 = arith.addf %434, %438 : vector<16x24xf32>
    %440 = vector.broadcast %20 : vector<1x24xf32> to vector<16x24xf32>
    %441 = arith.addf %439, %440 : vector<16x24xf32>
    %cst_151 = arith.constant 0.000000e+00 : f32
    %cst_152 = arith.constant 6.000000e+00 : f32
    %442 = vector.broadcast %cst_151 : f32 to vector<16x24xf32>
    %443 = arith.maximumf %442, %441 : vector<16x24xf32>
    %444 = vector.broadcast %cst_152 : f32 to vector<16x24xf32>
    %445 = arith.minimumf %444, %443 : vector<16x24xf32>
    %c112 = arith.constant 112 : index
    %c0_153 = arith.constant 0 : index
    %446 = vector.load %arg12[%c112, %c0_153] : memref<128x24xf32, #tpu.memory_space<vmem>>, vector<16x24xf32>
    tpu.vector_store %arg12[%c112, %c0_153], %445 {strides = array<i32>} : memref<128x24xf32, #tpu.memory_space<vmem>>, vector<16x24xf32>,
    %c0_154 = arith.constant 0 : index
    %c0_155 = arith.constant 0 : index
    %447 = vector.load %arg12[%c0_154, %c0_155] : memref<128x24xf32, #tpu.memory_space<vmem>>, vector<128x24xf32>
    %c0_156 = arith.constant 0 : index
    %c0_157 = arith.constant 0 : index
    %448 = vector.load %arg8[%c0_156, %c0_157] : memref<24x128xf32, #tpu.memory_space<vmem>>, vector<24x128xf32>
    %cst_158 = arith.constant dense<0.000000e+00> : vector<128x128xf32>
    %449 = tpu.matmul %447, %448, %cst_158 {dimension_numbers = #tpu.dot_dimension_numbers<[1], [0], [0], [1], [0, 0, 1, 1], [], []>} : vector<128x24xf32>, vector<24x128xf32>, vector<128x128xf32> -> vector<128x128xf32>
    %c0_159 = arith.constant 0 : index
    %c0_160 = arith.constant 0 : index
    %450 = vector.load %arg9[%c0_159, %c0_160] : memref<1x128xf32, #tpu.memory_space<vmem>>, vector<1x128xf32>
    %451 = vector.broadcast %450 : vector<1x128xf32> to vector<128x128xf32>
    %452 = arith.addf %449, %451 : vector<128x128xf32>
    %c0_161 = arith.constant 0 : index
    %c0_162 = arith.constant 0 : index
    %c0_163 = arith.constant 0 : index
    %453 = vector.load %arg10[%c0_161, %c0_162, %c0_163] : memref<1x128x128xf32, #tpu.memory_space<vmem>>, vector<1x128x128xf32>
    %454 = vector.shape_cast %453 : vector<1x128x128xf32> to vector<128x128xf32>
    %455 = vector.shape_cast %452 : vector<128x128xf32> to vector<1x128x128xf32>
    tpu.vector_store %arg10[%c0_161, %c0_162, %c0_163], %455 {strides = array<i32>} : memref<1x128x128xf32, #tpu.memory_space<vmem>>, vector<1x128x128xf32>,
    return
  }
  func.func @transform_0(%arg0: i32, %arg1: i32) -> (i32, i32, i32) {
    %c0_i32 = arith.constant 0 : i32
    %c0_i32_0 = arith.constant 0 : i32
    %c0_i32_1 = arith.constant 0 : i32
    return %arg0, %c0_i32, %c0_i32_0 : i32, i32, i32
  }
  func.func @transform_1(%arg0: i32, %arg1: i32) -> (i32, i32) {
    %c0_i32 = arith.constant 0 : i32
    %c0_i32_0 = arith.constant 0 : i32
    %c0_i32_1 = arith.constant 0 : i32
    return %c0_i32, %c0_i32_0 : i32, i32
  }
  func.func @transform_2(%arg0: i32, %arg1: i32) -> (i32, i32) {
    %c0_i32 = arith.constant 0 : i32
    %c0_i32_0 = arith.constant 0 : i32
    %c0_i32_1 = arith.constant 0 : i32
    return %c0_i32, %c0_i32_0 : i32, i32
  }
  func.func @transform_3(%arg0: i32, %arg1: i32) -> (i32, i32) {
    %c0_i32 = arith.constant 0 : i32
    %c0_i32_0 = arith.constant 0 : i32
    %c0_i32_1 = arith.constant 0 : i32
    return %c0_i32, %c0_i32_0 : i32, i32
  }
  func.func @transform_4(%arg0: i32, %arg1: i32) -> (i32, i32) {
    %c0_i32 = arith.constant 0 : i32
    %c0_i32_0 = arith.constant 0 : i32
    %c0_i32_1 = arith.constant 0 : i32
    return %c0_i32, %c0_i32_0 : i32, i32
  }
  func.func @transform_5(%arg0: i32, %arg1: i32) -> (i32, i32) {
    %c0_i32 = arith.constant 0 : i32
    %c0_i32_0 = arith.constant 0 : i32
    %c0_i32_1 = arith.constant 0 : i32
    return %c0_i32, %c0_i32_0 : i32, i32
  }
  func.func @transform_6(%arg0: i32, %arg1: i32) -> (i32, i32) {
    %c0_i32 = arith.constant 0 : i32
    %c0_i32_0 = arith.constant 0 : i32
    %c0_i32_1 = arith.constant 0 : i32
    return %c0_i32, %c0_i32_0 : i32, i32
  }
  func.func @transform_7(%arg0: i32, %arg1: i32) -> (i32, i32) {
    %c0_i32 = arith.constant 0 : i32
    %c0_i32_0 = arith.constant 0 : i32
    %c0_i32_1 = arith.constant 0 : i32
    return %c0_i32, %c0_i32_0 : i32, i32
  }
  func.func @transform_8(%arg0: i32, %arg1: i32) -> (i32, i32, i32) {
    %c0_i32 = arith.constant 0 : i32
    %c0_i32_0 = arith.constant 0 : i32
    return %arg0, %arg1, %c0_i32 : i32, i32, i32
  }
}

</mosaic_0001>

<bundles_post_ra>
// kernel: tpu_custom_call.1
= control target key start
LH: loop header
LB: loop body
LE: loop exit
PB: predicated region body
PF: predicated region fallthrough
CT: control target
= control target key end

     0   :  { %13 = vsyncpa [#allocation5], 0  ;;  %s2844_s0 = inlined_call_operand.vmem [shape: f32[2,324,4], index: 0, kind: input, shape index: {}]   ;;  %s2845_s1 = inlined_call_operand.vmem [shape: f32[324,1], index: 1, kind: input, shape index: {}]   ;;  %s2846_s2 = inlined_call_operand.vmem [shape: f32[4,24], index: 2, kind: input, shape index: {}]   ;;  %s2847_s3 = inlined_call_operand.vmem [shape: f32[1,24], index: 3, kind: input, shape index: {}]   ;;  %s2848_s4 = inlined_call_operand.vmem [shape: f32[9,24], index: 4, kind: input, shape index: {}]   ;;  %s2849_s5 = inlined_call_operand.vmem [shape: f32[1,24], index: 5, kind: input, shape index: {}]   ;;  %s2850_s6 = inlined_call_operand.vmem [shape: f32[24,128], index: 6, kind: input, shape index: {}]   ;;  %s2851_s7 = inlined_call_operand.vmem [shape: f32[1,128], index: 7, kind: input, shape index: {}]   ;;  %s2852_s8 = inlined_call_operand.hbm [shape: f32[2,256,128], index: 8, kind: output, shape index: {}]  }
   0x1   :  { %15 = vsyncpa [#allocation5 + $0x1], 0  ;;  %s2128_s27 = smov 0   ;;  %s2130_s28 = smov 0  }
   0x2   :  { %s2132_s29 = smov 0   ;;  %s2134_s30 = smov 0  }
   0x3   :  { %s2136_s9 = smov 0   ;;  %s2138_s10 = smov 0  }
   0x4   :  { %s2140_s11 = smov 0   ;;  %s2142_s12 = smov 0  }
   0x5 LB: > { %s1695_s13 = sadd.s32 4294967295, %s2075_s12   ;;  %s1696_s14 = sadd.s32 4294967294, %s2075_s12   ;;  %s2075_s12 = sphi %s2142_s12, %s21_s12   ;;  %s2071_s11 = sphi %s2140_s11, %s2871_s11   ;;  %s2067_s10 = sphi %s2138_s10, %s2870_s10   ;;  %s2063_s9 = sphi %s2136_s9, %s2869_s9   ;;  %s2059_s30 = sphi %s2134_s30, %s2868_s30   ;;  %s2055_s29 = sphi %s2132_s29, %s2867_s29   ;;  %s2051_s28 = sphi %s2130_s28, %s2866_s28   ;;  %s2047_s27 = sphi %s2128_s27, %s2865_s27  }
   0x6   : > { %s30_s15 = sadd.s32 1, %s2067_s10  ;;  %s33_s16 = sadd.s32 1, %s2071_s11 }
   0x7   : > { %p31_p0 = scmp.ge.s32.totalorder %s30_s15, 2  ;;  %p225_p1 = scmp.ne.s32.totalorder %s2055_s29, %s2051_s28 }
   0x8   : > { %p226_p2 = scmp.eq.s32.totalorder %s1695_s13, 3  ;;  %p231_p5 = scmp.ne.s32.totalorder %s2051_s28, %s2047_s27 }
   0x9   : > { %s2873_s15 = smov (%p31_p0, %s30_s15), 0  ;;  %s2875_s16 = smov (!%p31_p0, %s33_s16), %s2071_s11 }
   0xa   : > { %s211_s17 = ssub.s32 %s2067_s10, %s2873_s15  ;;  %p2179_p3 = por %p226_p2, %p225_p1 }
   0xb   : > { %p35_p4 = scmp.ge.s32.totalorder %s2875_s16, 2  ;;  %p232_p6 = scmp.eq.s32.totalorder %s1696_s14, 3 }
   0xc   : > { %p1699_p7 = scmp.ge.s32.totalorder %s2075_s12, 1  ;;  %p279_p9 = scmp.lt.s32.totalorder %s2075_s12, 5 }
   0xd   : > { %s2877_s16 = smov (%p35_p4, %s2875_s16), 0  ;;  %p2188_p8 = por %p232_p6, %p231_p5 }
   0xe   : > { %s210_s20 = ssub.s32 %s2071_s11, %s2877_s16  ;;  %s215_s21 = sadd.s32 1, %s2055_s29 }
   0xf   : > { %s212_s22 = sor.u32 %s211_s17, %s210_s20  ;;  %p280_p10 = pnand %p1699_p7, %p279_p9 }
  0x10   : > { %p213_p11 = scmp.eq.s32.totalorder %s212_s22, 0 }
  0x11   : > { %283 = sbr.rel (%p280_p10) target bundleno = 608 (0x260), region = 52 }
  0x12   : > { %s2197_s23 = scalar_select %p213_p11, %s2055_s29, %s215_s21  }
  0x18   : > { %v344_v0 = vld [vmem:[%s2846_s2] sm:$0xf]  ;;  %vm422_vm0 = vcmask 1043456   ;;  %p313_p12 = scmp.lt.s32.totalorder %s2063_s9, 1  ;;  %v2077_v1 = vmov 0.0   ;;  %vm2078_vm1 = vmmov 0  }
  0x19   : > { %1795 = vmatprep.subr.mxu0 %v2077_v1  ;;  %1797 = vmatprep.mubr.msk.f32.mxu0 %vm2078_vm1, %v2077_v1  ;;  %s319_s26 = smul.u32 144, %s2059_s30  ;;  %v2079_v2 = vmov 0   ;;  %vm352_vm2 = vcmask 31744   ;;  %v1380_v49 = vld [vmem:[%s2850_s6] sm:$0xff]  ;;  %v1381_v50 = vld [vmem:[%s2850_s6 + $0x8] sm:$0xff]  ;;  %v1382_v56 = vld [vmem:[%s2850_s6 + $0x10] sm:$0xff] }
  0x1a   : > { %1796 = vmatpush3.msk.msra.mxu0 %vm422_vm0, %v344_v0  ;;  %1900 = vmatprep.subr.mxu1 %v2077_v1  ;;  %s314_s13 = scalar_select %p313_p12, %s2063_s9, 1  ;;  %v1896_v51 = vpack.c.bf16 %v1381_v50, %v1380_v49  ;;  %vm814_vm3 = vcmask 195584   ;;  %vm837_vm4 = vcmask 191488  }
  0x1b   : > { %1901 = vmatpush3.msk.msra.mxu1 %vm422_vm0, %v344_v0  ;;  %1845 = vmatprep.mubr.msk.f32.mxu1 %vm2078_vm1, %v2077_v1  ;;  %s2214_s20 = scalar_lea.vmem %s2845_s1, %s319_s26  ;;  %s310_s22 = sand.u32 1, %s2051_s28  }
  0x1c   : > { %s1902_s21 = smul.u32 328, %s314_s13  ;;  %1979 = vset.pattern.permute.xlu0 %v2079_v2  ;;  %v653_v3 = vld [vmem:[%s2214_s20] sm:$0xff]  ;;  %1980 = vset.pattern.permute.xlu1 %v2079_v2  ;;  %v655_v4 = vld [vmem:[%s2214_s20 + $0x10] sm:$0xff]  ;;  %v654_v5 = vld [vmem:[%s2214_s20 + $0x8] sm:$0xff]  ;;  %s1700_s24 = sshll.u32 %s310_s22, 7 }
  0x1d   : > { %678 = vperm.xlu0 %1979, %v653_v3   ;;  %688 = vperm.xlu1 %1980, %v655_v4   ;;  %v656_v8 = vld [vmem:[%s2214_s20 + $0x18] sm:$0xff]  ;;  %v657_v11 = vld [vmem:[%s2214_s20 + $0x20] sm:$0xff]  ;;  %v658_v12 = vld [vmem:[%s2214_s20 + $0x28] sm:$0xff]  ;;  %s1747_s13 = sshll.u32 %s2059_s30, 4  ;;  %s1748_s17 = sshll.u32 %s2063_s9, 5 }
  0x1e   : > { %s317_s25 = scalar_lea.vmem %s2844_s0, %s1902_s21  ;;  %v659_v15 = vld [vmem:[%s2214_s20 + $0x30] sm:$0xff]  ;;  %v660_v16 = vld [vmem:[%s2214_s20 + $0x38] sm:$0xff]  ;;  %v661_v19 = vld [vmem:[%s2214_s20 + $0x40] sm:$0xff]  ;;  %1897 = vmatprep.subr.bf16.mxu1 %v1896_v51 }
  0x1f   : > { %s2221_s14 = scalar_lea.vmem %s317_s25, %s319_s26  ;;  %v662_v20 = vld [vmem:[%s2214_s20 + $0x48] sm:$0xff]  ;;  %v663_v23 = vld [vmem:[%s2214_s20 + $0x50] sm:$0xff]  ;;  %v664_v24 = vld [vmem:[%s2214_s20 + $0x58] sm:$0xff]  ;;  %s2762_s26 = scalar_lea.vmem [#allocation4], %s1700_s24 }
  0x20   : > { %v321_v6 = vld [vmem:[%s2221_s14] sm:$0xff]  ;;  %v322_v9 = vld [vmem:[%s2221_s14 + $0x8] sm:$0xff]  ;;  %v323_v13 = vld [vmem:[%s2221_s14 + $0x10] sm:$0xff]  ;;  %s1615_s24 = sshll.u32 %s2762_s26, 4  ;;  %s2786_s24 = int_to_ptr.vmem [resolvable:$true] %s1615_s24 }
  0x21   : > { %v337_v7 = vld [vmem:[%s2221_s14 + $0x80] sm:$0xff]  ;;  %1798 = vmatmul.mubr.msk.f32.vlgmr.msra.gmra.mrb[0].mxu0 %vm352_vm2, %v321_v6  ;;  %v338_v10 = vld [vmem:[%s2221_s14 + $0x88] sm:$0xff]  ;;  %683 = vperm.xlu0 %1979, %v654_v5   ;;  %v339_v14 = vld [vmem:[%s2221_s14 + $0x90] sm:$0xff] }
  0x22   : > { %1846 = vmatmul.mubr.msk.f32.vlgmr.msra.gmra.mrb[0].mxu1 %vm352_vm2, %v337_v7  ;;  %1800 = vmatprep.mubr.msk.f32.mxu0 %vm2078_vm1, %v2077_v1  ;;  %v324_v17 = vld [vmem:[%s2221_s14 + $0x18] sm:$0xff]  ;;  %v325_v21 = vld [vmem:[%s2221_s14 + $0x20] sm:$0xff]  ;;  %v326_v25 = vld [vmem:[%s2221_s14 + $0x28] sm:$0xff] }
  0x23   : > { %1848 = vmatprep.mubr.msk.f32.mxu1 %vm2078_vm1, %v2077_v1  ;;  %693 = vperm.xlu1 %1980, %v656_v8   ;;  %v340_v18 = vld [vmem:[%s2221_s14 + $0x98] sm:$0xff]  ;;  %v341_v22 = vld [vmem:[%s2221_s14 + $0xa0] sm:$0xff]  ;;  %v342_v26 = vld [vmem:[%s2221_s14 + $0xa8] sm:$0xff] }
  0x24   : > { %v665_v27 = vld [vmem:[%s2214_s20 + $0x60] sm:$0xff]  ;;  %v666_v28 = vld [vmem:[%s2214_s20 + $0x68] sm:$0xff]  ;;  %v327_v29 = vld [vmem:[%s2221_s14 + $0x30] sm:$0xff]  ;;  %1899 = vmatpush3.bf16.msra.mxu1 %v1896_v51 }
  0x25   : > { %1801 = vmatmul.mubr.msk.f32.gmra.mrb[2].mxu0 %vm352_vm2, %v322_v9  ;;  %698 = vperm.xlu0 %1979, %v657_v11   ;;  %v343_v30 = vld [vmem:[%s2221_s14 + $0xb0] sm:$0xf]  ;;  %v668_v32 = vld [vmem:[%s2214_s20 + $0x78] sm:$0xff]  ;;  %v669_v34 = vld [vmem:[%s2214_s20 + $0x80] sm:$0xff] }
  0x26   : > { %1849 = vmatmul.mubr.msk.f32.gmra.mrb[2].mxu1 %vm352_vm2, %v338_v10  ;;  %1803 = vmatprep.mubr.msk.f32.mxu0 %vm2078_vm1, %v2077_v1  ;;  %v667_v31 = vld [vmem:[%s2214_s20 + $0x70] sm:$0xff]  ;;  %v328_v33 = vld [vmem:[%s2221_s14 + $0x38] sm:$0xff]  ;;  %v670_v35 = vld [vmem:[%s2214_s20 + $0x88] sm:$0xff] }
  0x27   : > { %1851 = vmatprep.mubr.msk.f32.mxu1 %vm2078_vm1, %v2077_v1  ;;  %703 = vperm.xlu1 %1980, %v658_v12   ;;  %v329_v36 = vld [vmem:[%s2221_s14 + $0x40] sm:$0xff]  ;;  %v671_v37 = vld [vmem:[%s2214_s20 + $0x90] sm:$0xff]  ;;  %v672_v38 = vld [vmem:[%s2214_s20 + $0x98] sm:$0xff] }
  0x28   : > { %v330_v39 = vld [vmem:[%s2221_s14 + $0x48] sm:$0xff]  ;;  %v673_v40 = vld [vmem:[%s2214_s20 + $0xa0] sm:$0xff]  ;;  %v331_v42 = vld [vmem:[%s2221_s14 + $0x50] sm:$0xff]  ;;  %1870 = vmatprep.subr.mxu1 %v1382_v56 }
  0x29   : > { %1804 = vmatmul.mubr.msk.f32.gmra.mrb[4].mxu0 %vm352_vm2, %v323_v13  ;;  %708 = vperm.xlu0 %1979, %v659_v15   ;;  %v674_v41 = vld [vmem:[%s2214_s20 + $0xa8] sm:$0xff]  ;;  %v675_v43 = vld [vmem:[%s2214_s20 + $0xb0] sm:$0xf]  ;;  %v332_v44 = vld [vmem:[%s2221_s14 + $0x58] sm:$0xff]  ;;  %s1612_s20 = sadd.s32 %s1748_s17, %s1747_s13  ;;  %s1981_s13 = scalar_lea.vmem %s2786_s24, 2048 }
  0x2a   : > { %1852 = vmatmul.mubr.msk.f32.gmra.mrb[4].mxu1 %vm352_vm2, %v339_v14  ;;  %1806 = vmatprep.mubr.msk.f32.mxu0 %vm2078_vm1, %v2077_v1  ;;  %v333_v45 = vld [vmem:[%s2221_s14 + $0x60] sm:$0xff]  ;;  %v334_v46 = vld [vmem:[%s2221_s14 + $0x68] sm:$0xff]  ;;  %v335_v47 = vld [vmem:[%s2221_s14 + $0x70] sm:$0xff]  ;;  %s1749_s21 = sshll.u32 %s1612_s20, 7  ;;  %p1982_p13 = scmp.ne.s32.totalorder %s2786_s24, %s1981_s13 }
  0x2b   : > { %1854 = vmatprep.mubr.msk.f32.mxu1 %vm2078_vm1, %v2077_v1  ;;  %713 = vperm.xlu1 %1980, %v660_v16   ;;  %v336_v48 = vld [vmem:[%s2221_s14 + $0x78] sm:$0xff]  ;;  %v2368_v3 = vld [vmem:[%s2847_s3] ss:$0 sm:$0xff]  ;;  %s2784_s25 = scalar_lea.hbm %s2852_s8, %s1749_s21  ;;  %s2792_s14 = scalar_lea.sflag [#allocation5], %s310_s22 }
  0x2c   : > { %1871 = vmatpush3.msra.mxu1 %v1382_v56  ;;  %p1983_p0 = pnand %p1982_p13, %p2179_p3  ;;  %s2080_s17 = smov [#allocation4]  }
  0x2d   : > { %1807 = vmatmul.mubr.msk.f32.gmra.mrb[6].mxu0 %vm352_vm2, %v324_v17  ;;  %718 = vperm.xlu0 %1979, %v661_v19   ;;  %s1985_s20 = sshll.u32 %s2080_s17, 4  ;;  %s1986_s20 = int_to_ptr.vmem [resolvable:$false] %s1985_s20 }
  0x2e   : > { %1855 = vmatmul.mubr.msk.f32.gmra.mrb[6].mxu1 %vm352_vm2, %v340_v18  ;;  %1809 = vmatprep.mubr.msk.f32.mxu0 %vm2078_vm1, %v2077_v1  ;;  %p1984_p1 = pneg %p1983_p0  ;;  %s1987_s21 = scalar_lea.vmem %s1986_s20, 4096 }
  0x2f   : > { %1857 = vmatprep.mubr.msk.f32.mxu1 %vm2078_vm1, %v2077_v1  ;;  %723 = vperm.xlu1 %1980, %v662_v20   ;;  %p1988_p2 = scmp.lt.s32.totalorder %s2786_s24, %s1986_s20  ;;  %p1989_p4 = scmp.lt.s32.totalorder %s1987_s21, %s1981_s13 }
  0x31   : > { %1810 = vmatmul.mubr.msk.f32.gmra.mrb[8].mxu0 %vm352_vm2, %v325_v21  ;;  %728 = vperm.xlu0 %1979, %v663_v23   ;;  %p1990_p5 = por %p1989_p4, %p1988_p2 }
  0x32   : > { %1858 = vmatmul.mubr.msk.f32.gmra.mrb[8].mxu1 %vm352_vm2, %v341_v22  ;;  %1812 = vmatprep.mubr.msk.f32.mxu0 %vm2078_vm1, %v2077_v1  ;;  %v844_v22 = vlaneseq }
  0x33   : > { %1860 = vmatprep.mubr.msk.f32.mxu1 %vm2078_vm1, %v2077_v1  ;;  %733 = vperm.xlu1 %1980, %v664_v24   ;;  %p1991_p6 = pnand %p1990_p5, %p1984_p1 }
  0x35   : > { %1813 = vmatmul.mubr.msk.f32.gmra.mrb[10].mxu0 %vm352_vm2, %v326_v25  ;;  %738 = vperm.xlu0 %1979, %v665_v27  }
  0x36   : > { %1861 = vmatmul.mubr.msk.f32.gmra.mrb[10].mxu1 %vm352_vm2, %v342_v26  ;;  %1815 = vmatprep.mubr.msk.f32.mxu0 %vm2078_vm1, %v2077_v1 }
  0x37   : > { %1863 = vmatprep.mubr.msk.f32.mxu1 %vm2078_vm1, %v2077_v1  ;;  %743 = vperm.xlu1 %1980, %v666_v28  }
  0x39   : > { %1816 = vmatmul.mubr.msk.f32.gmra.mrb[12].mxu0 %vm352_vm2, %v327_v29  ;;  %748 = vperm.xlu0 %1979, %v667_v31  }
  0x3a   : > { %1864 = vmatmul.mubr.msk.f32.gmra.mrb[12].mxu1 %vm352_vm2, %v343_v30  ;;  %1818 = vmatprep.mubr.msk.f32.mxu0 %vm2078_vm1, %v2077_v1 }
  0x3b   : > { %753 = vperm.xlu1 %1980, %v668_v32  }
  0x3d   : > { %1819 = vmatmul.mubr.msk.f32.gmra.mrb[14].mxu0 %vm352_vm2, %v328_v33  ;;  %758 = vperm.xlu0 %1979, %v669_v34  }
  0x3e   : > { %1821 = vmatprep.mubr.msk.f32.mxu0 %vm2078_vm1, %v2077_v1 }
  0x3f   : > { %763 = vperm.xlu1 %1980, %v670_v35  }
  0x41   : > { %1822 = vmatmul.mubr.msk.f32.gmra.mrb[16].mxu0 %vm352_vm2, %v329_v36  ;;  %768 = vperm.xlu0 %1979, %v671_v37   ;;  %v2382_v37 = vshrl.u32 %v844_v22, 7 }
  0x42   : > { %1824 = vmatprep.mubr.msk.f32.mxu0 %vm2078_vm1, %v2077_v1 }
  0x43   : > { %773 = vperm.xlu1 %1980, %v672_v38   ;;  %v846_v50 = vsub.s32 0, %v2382_v37  ;;  %v854_v51 = vsub.s32 1, %v2382_v37  ;;  %v864_v22 = vsub.s32 2, %v2382_v37 }
  0x45   : > { %1825 = vmatmul.mubr.msk.f32.gmra.mrb[18].mxu0 %vm352_vm2, %v330_v39  ;;  %778 = vperm.xlu0 %1979, %v673_v40  }
  0x46   : > { %1827 = vmatprep.mubr.msk.f32.mxu0 %vm2078_vm1, %v2077_v1 }
  0x47   : > { %783 = vperm.xlu1 %1980, %v674_v41  }
  0x49   : > { %1828 = vmatmul.mubr.msk.f32.gmra.mrb[20].mxu0 %vm352_vm2, %v331_v42  ;;  %788 = vperm.xlu0 %1979, %v675_v43  }
  0x4a   : > { %1830 = vmatprep.mubr.msk.f32.mxu0 %vm2078_vm1, %v2077_v1 }
  0x4d   : > { %1831 = vmatmul.mubr.msk.f32.gmra.mrb[22].mxu0 %vm352_vm2, %v332_v44 }
  0x4e   : > { %1833 = vmatprep.mubr.msk.f32.mxu0 %vm2078_vm1, %v2077_v1 }
  0x51   : > { %1834 = vmatmul.mubr.msk.f32.gmra.mrb[24].mxu0 %vm352_vm2, %v333_v45 }
  0x52   : > { %1836 = vmatprep.mubr.msk.f32.mxu0 %vm2078_vm1, %v2077_v1 }
  0x55   : > { %1837 = vmatmul.mubr.msk.f32.gmra.mrb[26].mxu0 %vm352_vm2, %v334_v46 }
  0x56   : > { %1839 = vmatprep.mubr.msk.f32.mxu0 %vm2078_vm1, %v2077_v1 }
  0x59   : > { %1840 = vmatmul.mubr.msk.f32.gmra.mrb[28].mxu0 %vm352_vm2, %v335_v47 }
  0x5a   : > { %1842 = vmatprep.mubr.msk.f32.mxu0 %vm2078_vm1, %v2077_v1 }
  0x5d   : > { %1843 = vmatmul.mubr.msk.f32.gmra.mrb[30].mxu0 %vm352_vm2, %v336_v48 }
  0x9c   : > { %v679_v52 = vpop.permute.xlu0 %678  ;;  %v2338_v53 = vpop.permute.xlu1 %688 }
  0xa0   : > { %v684_v54 = vpop.permute.xlu0 %683 }
  0xa2   : > { %v2340_v55 = vpop.permute.xlu1 %693 }
  0xa4   : > { %v2345_v57 = vpop.permute.xlu0 %698 }
  0xa6   : > { %v2347_v58 = vpop.permute.xlu1 %703 }
  0xa8   : > { %v2349_v59 = vpop.permute.xlu0 %708 }
  0xaa   : > { %v2351_v60 = vpop.permute.xlu1 %713 }
  0xac   : > { %v2353_v61 = vpop.permute.xlu0 %718 }
  0xae   : > { %v2355_v62 = vpop.permute.xlu1 %723 }
  0xb0   : > { %v2357_v63 = vpop.permute.xlu0 %728 }
  0xb2   : > { %v2359_v0 = vpop.permute.xlu1 %733 }
  0xb4   : > { %v2361_v1 = vpop.permute.xlu0 %738 }
  0xb6   : > { %v2363_v2 = vpop.permute.xlu1 %743 }
  0xb8   : > { %v2370_v4 = vpop.permute.xlu0 %748 }
  0xba   : > { %v2372_v5 = vpop.permute.xlu1 %753 }
  0xbc   : > { %v759_v23 = vpop.permute.xlu0 %758 }
  0xbe   : > { %v764_v28 = vpop.permute.xlu1 %763 }
  0xf4   : > { %v492_v6 = vpop.f32.mrb[0].mxu0 }
  0xf5   : > { %v572_v7 = vpop.f32.mrb[0].mxu1  ;;  %v493_v8 = vadd.f32 %v2368_v3, %v492_v6  ;;  %v1799_v9 = vpop.f32.mrb[1].mxu0 }
  0xf6   : > { %v573_v10 = vadd.f32 %v2368_v3, %v572_v7  ;;  %v1847_v11 = vpop.f32.mrb[1].mxu1  ;;  %v839_v9 = vld [vmem:[%s2848_s4] sm:$0xff] }
  0xf7   : > { %v606_v12 = vmax.f32 %v493_v8, 0.0  ;;  %v774_v8 = vpop.permute.xlu1 %773 }
  0xf8   : > { %v622_v13 = vmax.f32 %v573_v10, 0.0  ;;  %v497_v14 = vpop.f32.mrb[2].mxu0 }
  0xf9   : > { %v577_v15 = vpop.f32.mrb[2].mxu1  ;;  %v629_v16 = vmin.f32 %v606_v12, 6.0  ;;  %v498_v17 = vadd.f32 %v2368_v3, %v497_v14  ;;  %v1802_v18 = vpop.f32.mrb[3].mxu0 }
  0xfa   : > { %v645_v19 = vmin.f32 %v622_v13, 6.0  ;;  %v578_v20 = vadd.f32 %v2368_v3, %v577_v15  ;;  %v1850_v21 = vpop.f32.mrb[3].mxu1  ;;  %v2400_v18 = vrot.slane %v839_v9, %v854_v51 }
  0xfb   : > { %v791_v24 = vmul.f32 %v679_v52, %v629_v16  ;;  %v607_v25 = vmax.f32 %v498_v17, 0.0  ;;  %v769_v52 = vpop.permute.xlu0 %768  ;;  %v2398_v17 = vrot.slane %v839_v9, %v846_v50 }
  0xfc   : > { %v623_v26 = vmax.f32 %v578_v20, 0.0  ;;  %v807_v27 = vmul.f32 %v759_v23, %v645_v19  ;;  %v502_v29 = vpop.f32.mrb[4].mxu0  ;;  %v874_v23 = vsub.s32 3, %v2382_v37 }
  0xfd   : > { %v582_v30 = vpop.f32.mrb[4].mxu1  ;;  %815 = vst.msk [vmem:[#allocation2] sm:$0xff] %vm814_vm3, %v791_v24  ;;  %v630_v31 = vmin.f32 %v607_v25, 6.0  ;;  %v503_v32 = vadd.f32 %v2368_v3, %v502_v29  ;;  %v1805_v33 = vpop.f32.mrb[5].mxu0  ;;  %v894_v24 = vsub.s32 5, %v2382_v37 }
  0xfe   : > { %v646_v34 = vmin.f32 %v623_v26, 6.0  ;;  %v583_v35 = vadd.f32 %v2368_v3, %v582_v30  ;;  %v1853_v36 = vpop.f32.mrb[5].mxu1  ;;  %831 = vst.msk [vmem:[#allocation2 + $0x80] sm:$0xff] %vm814_vm3, %v807_v27  ;;  %v904_v30 = vsub.s32 6, %v2382_v37 }
  0xff   : > { %v792_v38 = vmul.f32 %v684_v54, %v630_v31  ;;  %v608_v39 = vmax.f32 %v503_v32, 0.0 }
 0x100   : > { %v624_v40 = vmax.f32 %v583_v35, 0.0  ;;  %v808_v41 = vmul.f32 %v764_v28, %v646_v34  ;;  %v507_v42 = vpop.f32.mrb[6].mxu0  ;;  %v884_v28 = vsub.s32 4, %v2382_v37 }
 0x101   : > { %v587_v43 = vpop.f32.mrb[6].mxu1  ;;  %816 = vst.msk [vmem:[#allocation2 + $0x8] sm:$0xff] %vm814_vm3, %v792_v38  ;;  %v631_v44 = vmin.f32 %v608_v39, 6.0  ;;  %v508_v45 = vadd.f32 %v2368_v3, %v507_v42  ;;  %v1808_v46 = vpop.f32.mrb[7].mxu0 }
 0x102   : > { %v647_v47 = vmin.f32 %v624_v40, 6.0  ;;  %v588_v48 = vadd.f32 %v2368_v3, %v587_v43  ;;  %v1856_v49 = vpop.f32.mrb[7].mxu1  ;;  %832 = vst.msk [vmem:[#allocation2 + $0x88] sm:$0xff] %vm814_vm3, %v808_v41  ;;  %v779_v40 = vpop.permute.xlu0 %778  ;;  %v2414_v41 = vrot.slane %v839_v9, %v864_v22  ;;  %v2416_v43 = vrot.slane %v839_v9, %v874_v23 }
 0x103   : > { %v793_v54 = vmul.f32 %v2338_v53, %v631_v44  ;;  %v609_v56 = vmax.f32 %v508_v45, 0.0  ;;  %v2429_v49 = vrot.slane %v839_v9, %v904_v30 }
 0x104   : > { %v625_v6 = vmax.f32 %v588_v48, 0.0  ;;  %v809_v7 = vmul.f32 %v769_v52, %v647_v47  ;;  %v512_v10 = vpop.f32.mrb[8].mxu0  ;;  %v842_v33 = vld [vmem:[#allocation2] sm:$0xff]  ;;  %v2421_v48 = vrot.slane %v839_v9, %v884_v28 }
 0x105   : > { %v592_v11 = vpop.f32.mrb[8].mxu1  ;;  %817 = vst.msk [vmem:[#allocation2 + $0x10] sm:$0xff] %vm814_vm3, %v793_v54  ;;  %v632_v12 = vmin.f32 %v609_v56, 6.0  ;;  %v513_v13 = vadd.f32 %v2368_v3, %v512_v10  ;;  %v1811_v14 = vpop.f32.mrb[9].mxu0  ;;  %v1230_v39 = vld [vmem:[#allocation2 + $0x80] sm:$0xff]  ;;  %v848_v47 = vmul.f32 %v2398_v17, %v842_v33 }
 0x106   : > { %v1859_v15 = vpop.f32.mrb[9].mxu1  ;;  %833 = vst.msk [vmem:[#allocation2 + $0x90] sm:$0xff] %vm814_vm3, %v809_v7  ;;  %v648_v53 = vmin.f32 %v625_v6, 6.0  ;;  %v593_v16 = vadd.f32 %v2368_v3, %v592_v11 }
 0x107   : > { %v794_v19 = vmul.f32 %v2340_v55, %v632_v12  ;;  %v610_v20 = vmax.f32 %v513_v13, 0.0  ;;  %v914_v55 = vsub.s32 7, %v2382_v37  ;;  %v2418_v37 = vrot.slane %v839_v9, %v894_v24 }
 0x108   : > { %v850_v21 = vld [vmem:[#allocation2 + $0x1] sm:$0xff]  ;;  %v517_v25 = vpop.f32.mrb[10].mxu0  ;;  %v810_v27 = vmul.f32 %v774_v8, %v648_v53  ;;  %v626_v35 = vmax.f32 %v593_v16, 0.0 }
 0x109   : > { %v597_v26 = vpop.f32.mrb[10].mxu1  ;;  %818 = vst.msk [vmem:[#allocation2 + $0x18] sm:$0xff] %vm814_vm3, %v794_v19  ;;  %v633_v29 = vmin.f32 %v610_v20, 6.0  ;;  %v1814_v31 = vpop.f32.mrb[11].mxu0  ;;  %v518_v34 = vadd.f32 %v2368_v3, %v517_v25  ;;  %v856_v36 = vmul.f32 %v2400_v18, %v850_v21  ;;  %v2431_v50 = vrot.slane %v839_v9, %v914_v55  ;;  %v1219_v51 = vld [vmem:[#allocation2 + $0x86] sm:$0xff] }
 0x10a   : > { %v1862_v32 = vpop.f32.mrb[11].mxu1  ;;  %834 = vst.msk [vmem:[#allocation2 + $0x98] sm:$0xff] %vm814_vm3, %v810_v27  ;;  %v1225_v52 = vld [vmem:[#allocation2 + $0x87] sm:$0xff]  ;;  %v2437_v10 = vmul.f32 %v1230_v39, %v2418_v37  ;;  %v649_v12 = vmin.f32 %v626_v35, 6.0  ;;  %v598_v15 = vadd.f32 %v2368_v3, %v597_v26  ;;  %v1307_v19 = vmul.f32 %v1219_v51, %v2398_v17 }
 0x10b   : > { %v795_v38 = vmul.f32 %v2345_v57, %v633_v29  ;;  %v611_v44 = vmax.f32 %v518_v34, 0.0  ;;  %v2427_v57 = vld [vmem:[%s2848_s4 + $0x8] ss:$0 sm:$0xff]  ;;  %v858_v13 = vadd.f32 %v856_v36, %v848_v47  ;;  %v1311_v20 = vmul.f32 %v1225_v52, %v2400_v18 }
 0x10c   : > { %v851_v42 = vld [vmem:[#allocation2 + $0x9] sm:$0xff]  ;;  %v522_v45 = vpop.f32.mrb[12].mxu0  ;;  %v2434_v8 = vmul.f32 %v2427_v57, %v1230_v39  ;;  %v811_v21 = vmul.f32 %v779_v40, %v649_v12  ;;  %v2450_v25 = vmul.f32 %v1230_v39, %v2414_v41  ;;  %v2453_v27 = vmul.f32 %v1219_v51, %v2429_v49 }
 0x10d   : > { %v602_v46 = vpop.f32.mrb[12].mxu1  ;;  %819 = vst.msk [vmem:[#allocation2 + $0x20] sm:$0xff] %vm814_vm3, %v795_v38  ;;  %v1817_v54 = vpop.f32.mrb[13].mxu0  ;;  %v843_v6 = vld [vmem:[#allocation2 + $0x8] sm:$0xff]  ;;  %v634_v11 = vmin.f32 %v611_v44, 6.0  ;;  %v857_v14 = vmul.f32 %v2400_v18, %v851_v42  ;;  %v523_v9 = vadd.f32 %v2368_v3, %v522_v45  ;;  %v2458_v30 = vmul.f32 %v1225_v52, %v2431_v50 }
 0x10e   : > { %v1865_v56 = vpop.f32.mrb[13].mxu1  ;;  %v860_v7 = vld [vmem:[#allocation2 + $0x2] sm:$0xff]  ;;  %v849_v23 = vmul.f32 %v2398_v17, %v843_v6  ;;  %835 = vst.msk [vmem:[#allocation2 + $0xa0] sm:$0xff] %vm814_vm3, %v811_v21  ;;  %v2465_v34 = vmul.f32 %v1219_v51, %v2416_v43  ;;  %v2468_v35 = vmul.f32 %v1225_v52, %v2421_v48  ;;  %v627_v36 = vmax.f32 %v598_v15, 0.0  ;;  %v1278_v6 = vld [vmem:[#allocation2 + $0x90] sm:$0xff]  ;;  %v784_v15 = vpop.permute.xlu1 %783 }
 0x10f   : > { %v796_v16 = vmul.f32 %v2347_v58, %v634_v11  ;;  %v866_v24 = vmul.f32 %v2414_v41, %v860_v7  ;;  %v1231_v26 = vld [vmem:[#allocation2 + $0x88] sm:$0xff]  ;;  %2855 = vst [vmem:[#allocation7_spill] sm:$0xff] %v2458_v30  ;;  %v612_v31 = vmax.f32 %v523_v9, 0.0  ;;  %v1313_v42 = vadd.f32 %v1311_v20, %v1307_v19 }
 0x110   : > { %v870_v53 = vld [vmem:[#allocation2 + $0x12] sm:$0xff]  ;;  %v2445_v22 = vpop.f32.mrb[14].mxu0  ;;  %v861_v58 = vld [vmem:[#allocation2 + $0xa] sm:$0xff]  ;;  %v2461_v55 = vmul.f32 %v2427_v57, %v1231_v26  ;;  %v859_v32 = vadd.f32 %v857_v14, %v849_v23  ;;  %v1317_v44 = vmul.f32 %v1231_v26, %v2414_v41  ;;  %v603_v52 = vadd.f32 %v2368_v3, %v602_v46 }
 0x111   : > { %v1820_v28 = vpop.f32.mrb[15].mxu0  ;;  %v876_v29 = vmul.f32 %v2416_v43, %v870_v53  ;;  %820 = vst.msk [vmem:[#allocation2 + $0x28] sm:$0xff] %vm814_vm3, %v796_v16  ;;  %v880_v33 = vld [vmem:[#allocation2 + $0x13] sm:$0xff]  ;;  %v868_v38 = vadd.f32 %v866_v24, %v858_v13  ;;  %v635_v45 = vmin.f32 %v612_v31, 6.0  ;;  %v867_v54 = vmul.f32 %v2414_v41, %v861_v58 }
 0x112   : > { %2856 = vst [vmem:[#allocation8_spill] sm:$0xff] %v2461_v55  ;;  %v946_v56 = vmul.f32 %v870_v53, %v2398_v17  ;;  %v890_v12 = vld [vmem:[#allocation2 + $0x14] sm:$0xff]  ;;  %v950_v13 = vmul.f32 %v880_v33, %v2400_v18  ;;  %v2481_v19 = vmul.f32 %v1231_v26, %v2418_v37  ;;  %v650_v20 = vmin.f32 %v627_v36, 6.0 }
 0x113   : > { %v878_v11 = vadd.f32 %v876_v29, %v868_v38  ;;  %v869_v16 = vadd.f32 %v867_v54, %v859_v32  ;;  %v797_v53 = vmul.f32 %v2349_v59, %v635_v45  ;;  %v1279_v21 = vld [vmem:[#allocation2 + $0x98] sm:$0xff]  ;;  %v886_v46 = vmul.f32 %v2421_v48, %v880_v33 }
 0x114   : > { %v871_v39 = vld [vmem:[#allocation2 + $0x1a] sm:$0xff]  ;;  %v2471_v47 = vpop.f32.mrb[16].mxu0  ;;  %2857 = vst [vmem:[#allocation9_spill] sm:$0xff] %v2481_v19  ;;  %v1319_v24 = vadd.f32 %v1317_v44, %v1313_v42  ;;  %v2486_v28 = vmul.f32 %v1278_v6, %v2429_v49  ;;  %v2489_v58 = vmul.f32 %v1278_v6, %v2416_v43  ;;  %v896_v31 = vmul.f32 %v2418_v37, %v890_v12 }
 0x115   : > { %v881_v40 = vld [vmem:[#allocation2 + $0x1b] sm:$0xff]  ;;  %v877_v51 = vmul.f32 %v2416_v43, %v871_v39  ;;  %v1823_v7 = vpop.f32.mrb[17].mxu0  ;;  %v947_v14 = vmul.f32 %v871_v39, %v2398_v17  ;;  %821 = vst.msk [vmem:[#allocation2 + $0x30] sm:$0xff] %vm814_vm3, %v797_v53  ;;  %v628_v59 = vmax.f32 %v603_v52, 0.0  ;;  %v812_v36 = vmul.f32 %v784_v15, %v650_v20 }
 0x116   : > { %v951_v9 = vmul.f32 %v881_v40, %v2400_v18  ;;  %v891_v23 = vld [vmem:[#allocation2 + $0x1c] sm:$0xff]  ;;  %2858 = vst [vmem:[#allocation10_spill] sm:$0xff] %v2486_v28  ;;  %v888_v33 = vadd.f32 %v886_v46, %v878_v11  ;;  %v952_v45 = vadd.f32 %v950_v13, %v946_v56  ;;  %v1323_v44 = vmul.f32 %v1279_v21, %v2416_v43 }
 0x117   : > { %v879_v32 = vadd.f32 %v877_v51, %v869_v16  ;;  %v956_v54 = vmul.f32 %v890_v12, %v2414_v41  ;;  %v887_v6 = vmul.f32 %v2421_v48, %v881_v40  ;;  %v957_v7 = vmul.f32 %v891_v23, %v2414_v41  ;;  %836 = vst.msk [vmem:[#allocation2 + $0xa8] sm:$0xff] %vm814_vm3, %v812_v36  ;;  %v789_v12 = vpop.permute.xlu0 %788 }
 0x118   : > { %v537_v29 = vpop.f32.mrb[18].mxu0  ;;  %v900_v26 = vld [vmem:[#allocation2 + $0x24] sm:$0xff]  ;;  %v953_v42 = vadd.f32 %v951_v9, %v947_v14  ;;  %v528_v51 = vadd.f32 %v2368_v3, %v2445_v22  ;;  %v2504_v14 = vld [vmem:[#allocation2 + $0x99] sm:$0xff]  ;;  %v897_v16 = vmul.f32 %v2418_v37, %v891_v23  ;;  %v2508_v22 = vmul.f32 %v1279_v21, %v2429_v49 }
 0x119   : > { %v910_v38 = vld [vmem:[#allocation2 + $0x25] sm:$0xff]  ;;  %v1826_v39 = vpop.f32.mrb[19].mxu0  ;;  %v906_v52 = vmul.f32 %v2429_v49, %v900_v26  ;;  %v962_v11 = vmul.f32 %v900_v26, %v2416_v43  ;;  %v1006_v56 = vmul.f32 %v900_v26, %v2398_v17  ;;  %v889_v9 = vadd.f32 %v887_v6, %v879_v32 }
 0x11a   : > { %v920_v15 = vld [vmem:[#allocation2 + $0x26] sm:$0xff]  ;;  %v1010_v13 = vmul.f32 %v910_v38, %v2400_v18  ;;  %2859 = vst [vmem:[#allocation11_spill] sm:$0xff] %v2508_v22  ;;  %v651_v53 = vmin.f32 %v628_v59, 6.0  ;;  %v898_v46 = vadd.f32 %v896_v31, %v888_v33  ;;  %v958_v36 = vadd.f32 %v956_v54, %v952_v45  ;;  %v2516_v59 = vld [vmem:[#allocation2 + $0x9a] sm:$0xff] }
 0x11b   : > { %v959_v39 = vadd.f32 %v957_v7, %v953_v42  ;;  %v1325_v19 = vadd.f32 %v1323_v44, %v1319_v24  ;;  %v916_v26 = vmul.f32 %v2431_v50, %v910_v38  ;;  %v2512_v55 = vmul.f32 %v2427_v57, %v920_v15 }
 0x11c   : > { %v542_v40 = vpop.f32.mrb[20].mxu0  ;;  %v1329_v28 = vmul.f32 %v2504_v14, %v2421_v48  ;;  %v813_v32 = vmul.f32 %v789_v12, %v651_v53  ;;  %v908_v6 = vadd.f32 %v906_v52, %v898_v46  ;;  %v964_v23 = vadd.f32 %v962_v11, %v958_v36  ;;  %v901_v21 = vld [vmem:[#allocation2 + $0x2c] sm:$0xff] }
 0x11d   : > { %v1829_v20 = vpop.f32.mrb[21].mxu0  ;;  %v1012_v30 = vadd.f32 %v1010_v13, %v1006_v56  ;;  %v911_v22 = vld [vmem:[#allocation2 + $0x2d] sm:$0xff]  ;;  %v613_v31 = vmax.f32 %v528_v51, 0.0  ;;  %v899_v45 = vadd.f32 %v897_v16, %v889_v9  ;;  %v968_v24 = vmul.f32 %v910_v38, %v2421_v48 }
 0x11e   : > { %v907_v42 = vmul.f32 %v2429_v49, %v901_v21  ;;  %838 = vst.msk [vmem:[#allocation2 + $0xb0] sm:$0xf] %vm837_vm4, %v813_v32  ;;  %v533_v44 = vadd.f32 %v2368_v3, %v2471_v47  ;;  %v2524_v7 = vmul.f32 %v920_v15, %v2418_v37  ;;  %v1016_v52 = vmul.f32 %v920_v15, %v2414_v41  ;;  %v921_v11 = vld [vmem:[#allocation2 + $0x2e] sm:$0xff] }
 0x11f   : > { %v538_v51 = vadd.f32 %v2368_v3, %v537_v29  ;;  %v543_v56 = vadd.f32 %v2368_v3, %v542_v40  ;;  %v917_v38 = vmul.f32 %v2431_v50, %v911_v22  ;;  %v1331_v12 = vadd.f32 %v1329_v28, %v1325_v19 }
 0x120   : > { %v547_v33 = vpop.f32.mrb[22].mxu0  ;;  %v909_v13 = vadd.f32 %v907_v42, %v899_v45  ;;  %v1335_v9 = vmul.f32 %v2516_v59, %v2418_v37  ;;  %v918_v16 = vadd.f32 %v916_v26, %v908_v6  ;;  %v2532_v47 = vadd.f32 %v968_v24, %v964_v23 }
 0x121   : > { %v1832_v54 = vpop.f32.mrb[23].mxu0  ;;  %v2534_v53 = vadd.f32 %v1016_v52, %v1012_v30  ;;  %v636_v20 = vmin.f32 %v613_v31, 6.0  ;;  %v927_v36 = vmul.f32 %v2427_v57, %v921_v11  ;;  %v963_v29 = vmul.f32 %v901_v21, %v2416_v43  ;;  %v2543_v30 = vld [vmem:[%s2849_s5] ss:$0 sm:$0xff] }
 0x122   : > { %v919_v15 = vadd.f32 %v917_v38, %v909_v13  ;;  %v614_v40 = vmax.f32 %v533_v44, 0.0  ;;  %v1007_v45 = vmul.f32 %v901_v21, %v2398_v17  ;;  %v615_v28 = vmax.f32 %v538_v51, 0.0 }
 0x123   : > { %v798_v19 = vmul.f32 %v2351_v60, %v636_v20  ;;  %v616_v42 = vmax.f32 %v543_v56, 0.0  ;;  %v1337_v6 = vadd.f32 %v1335_v9, %v1331_v12  ;;  %v548_v31 = vadd.f32 %v2368_v3, %v547_v33 }
 0x124   : > { %v552_v46 = vpop.f32.mrb[24].mxu0  ;;  %v929_v26 = vadd.f32 %v927_v36, %v919_v15  ;;  %v637_v23 = vmin.f32 %v614_v40, 6.0  ;;  %v1011_v24 = vmul.f32 %v911_v22, %v2400_v18  ;;  %v638_v54 = vmin.f32 %v615_v28, 6.0 }
 0x125   : > { %v1835_v32 = vpop.f32.mrb[25].mxu0  ;;  %822 = vst.msk [vmem:[#allocation2 + $0x38] sm:$0xff] %vm814_vm3, %v798_v19  ;;  %v1339_v44 = vld [vmem:[#allocation2 + $0xaa] sm:$0xff]  ;;  %v639_v60 = vmin.f32 %v616_v42, 6.0  ;;  %v553_v52 = vadd.f32 %v2368_v3, %v552_v46  ;;  %v965_v13 = vadd.f32 %v963_v29, %v959_v39  ;;  %v969_v38 = vmul.f32 %v911_v22, %v2421_v48 }
 0x126   : > { %v1345_v21 = vld [vmem:[#allocation2 + $0xab] sm:$0xff]  ;;  %v937_v56 = vadd.f32 %v2543_v30, %v929_v26  ;;  %v1341_v12 = vmul.f32 %v1339_v44, %v2429_v49  ;;  %v799_v33 = vmul.f32 %v2353_v61, %v637_v23  ;;  %v800_v20 = vmul.f32 %v2355_v62, %v638_v54 }
 0x127   : > { %v801_v15 = vmul.f32 %v2357_v63, %v639_v60  ;;  %v617_v36 = vmax.f32 %v548_v31, 0.0  ;;  %v1347_v32 = vmul.f32 %v1345_v21, %v2431_v50  ;;  %v618_v46 = vmax.f32 %v553_v52, 0.0  ;;  %v1351_v22 = vld [vmem:[#allocation2 + $0xac] sm:$0xff] }
 0x128   : > { %v557_v51 = vpop.f32.mrb[26].mxu0  ;;  %v1343_v40 = vadd.f32 %v1341_v12, %v1337_v6  ;;  %v975_v39 = vmul.f32 %v921_v11, %v2418_v37  ;;  %v1013_v29 = vadd.f32 %v1011_v24, %v1007_v45  ;;  %823 = vst.msk [vmem:[#allocation2 + $0x40] sm:$0xff] %vm814_vm3, %v799_v33  ;;  %824 = vst.msk [vmem:[#allocation2 + $0x48] sm:$0xff] %vm814_vm3, %v800_v20  ;;  %v939_v63 = vmax.f32 %v937_v56, 0.0 }
 0x129   : > { %v1838_v9 = vpop.f32.mrb[27].mxu0  ;;  %v558_v19 = vadd.f32 %v2368_v3, %v557_v51  ;;  %825 = vst.msk [vmem:[#allocation2 + $0x50] sm:$0xff] %vm814_vm3, %v801_v15  ;;  %v640_v61 = vmin.f32 %v617_v36, 6.0  ;;  %v971_v28 = vadd.f32 %v969_v38, %v965_v13  ;;  %v641_v42 = vmin.f32 %v618_v46, 6.0 }
 0x12a   : > { %v1017_v31 = vmul.f32 %v921_v11, %v2414_v41  ;;  %v928_v24 = vadd.f32 %v2512_v55, %v918_v16  ;;  %v941_v44 = vmin.f32 %v939_v63, 6.0  ;;  %v1349_v60 = vadd.f32 %v1347_v32, %v1343_v40 }
 0x12b   : > { %v619_v26 = vmax.f32 %v558_v19, 0.0  ;;  %v802_v45 = vmul.f32 %v2359_v0, %v640_v61  ;;  %v1353_v52 = vmul.f32 %v2427_v57, %v1351_v22  ;;  %v803_v51 = vmul.f32 %v2361_v1, %v641_v42 }
 0x12c   : > { %v562_v62 = vpop.f32.mrb[28].mxu0  ;;  %v978_v21 = vld [vmem:[#allocation2 + $0x36] sm:$0xff]  ;;  %v976_v13 = vadd.f32 %v2524_v7, %v2532_v47  ;;  %v1019_v38 = vadd.f32 %v1017_v31, %v1013_v29  ;;  %943 = vst.msk [vmem:[#allocation3 + $0x8] sm:$0xff] %vm814_vm3, %v941_v44  ;;  %v977_v55 = vadd.f32 %v975_v39, %v971_v28  ;;  %v2579_v36 = vadd.f32 %v2543_v30, %v928_v24 }
 0x12d   : > { %v563_v6 = vadd.f32 %v2368_v3, %v562_v62  ;;  %v1841_v23 = vpop.f32.mrb[29].mxu0  ;;  %v984_v54 = vld [vmem:[#allocation2 + $0x37] sm:$0xff]  ;;  %v642_v56 = vmin.f32 %v619_v26, 6.0  ;;  %v980_v12 = vmul.f32 %v978_v21, %v2429_v49  ;;  %v1022_v11 = vmul.f32 %v978_v21, %v2416_v43  ;;  %826 = vst.msk [vmem:[#allocation2 + $0x58] sm:$0xff] %vm814_vm3, %v802_v45  ;;  %827 = vst.msk [vmem:[#allocation2 + $0x60] sm:$0xff] %vm814_vm3, %v803_v51 }
 0x12e   : > { %v990_v16 = vld [vmem:[#allocation2 + $0x38] sm:$0xff]  ;;  %v1066_v9 = vmul.f32 %v978_v21, %v2398_v17  ;;  %v1070_v1 = vmul.f32 %v984_v54, %v2400_v18  ;;  %v986_v40 = vmul.f32 %v984_v54, %v2431_v50  ;;  %v1028_v32 = vmul.f32 %v984_v54, %v2421_v48 }
 0x12f   : > { %v620_v33 = vmax.f32 %v563_v6, 0.0  ;;  %v982_v47 = vadd.f32 %v980_v12, %v976_v13  ;;  %v1024_v20 = vadd.f32 %v1022_v11, %v2534_v53  ;;  %v804_v15 = vmul.f32 %v2363_v2, %v642_v56  ;;  %v979_v19 = vld [vmem:[#allocation2 + $0x3e] sm:$0xff]  ;;  %v1038_v62 = vld [vmem:[#allocation2 + $0x48] sm:$0xff] }
 0x130   : > { %v567_v0 = vpop.f32.mrb[30].mxu0  ;;  %v2583_v46 = vadd.f32 %v1353_v52, %v1349_v60  ;;  %v985_v39 = vld [vmem:[#allocation2 + $0x3f] sm:$0xff]  ;;  %v2589_v22 = vmul.f32 %v2427_v57, %v990_v16  ;;  %v1034_v53 = vmul.f32 %v990_v16, %v2418_v37  ;;  %v1072_v2 = vadd.f32 %v1070_v1, %v1066_v9  ;;  %v1039_v60 = vld [vmem:[#allocation2 + $0x50] sm:$0xff] }
 0x131   : > { %v1844_v7 = vpop.f32.mrb[31].mxu0  ;;  %v2586_v29 = vadd.f32 %v2368_v3, %v567_v0  ;;  %v981_v61 = vmul.f32 %v979_v19, %v2429_v49  ;;  %828 = vst.msk [vmem:[#allocation2 + $0x68] sm:$0xff] %vm814_vm3, %v804_v15  ;;  %v1030_v63 = vadd.f32 %v1028_v32, %v1024_v20  ;;  %v1076_v28 = vmul.f32 %v990_v16, %v2414_v41  ;;  %v991_v42 = vld [vmem:[#allocation2 + $0x40] sm:$0xff]  ;;  %v1044_v52 = vld [vmem:[#allocation2 + $0x49] sm:$0xff] }
 0x132   : > { %v1023_v26 = vmul.f32 %v979_v19, %v2416_v43  ;;  %v2596_v6 = vmin.f32 %v620_v33, 6.0  ;;  %v2598_v3 = vadd.f32 %v986_v40, %v982_v47  ;;  %v1029_v23 = vmul.f32 %v985_v39, %v2421_v48  ;;  %v1050_v1 = vld [vmem:[#allocation2 + $0x4a] sm:$0xff] }
 0x133   : > { %v1067_v31 = vmul.f32 %v979_v19, %v2398_v17  ;;  %v938_v45 = vmax.f32 %v2579_v36, 0.0  ;;  %v983_v24 = vadd.f32 %v981_v61, %v977_v55  ;;  %v1071_v21 = vmul.f32 %v985_v39, %v2400_v18 }
 0x134   : > { %v1025_v44 = vadd.f32 %v1023_v26, %v1019_v38  ;;  %v1040_v54 = vmul.f32 %v1038_v62, %v2429_v49  ;;  %v1078_v51 = vadd.f32 %v1076_v28, %v1072_v2  ;;  %v987_v56 = vmul.f32 %v985_v39, %v2431_v50  ;;  %v1045_v32 = vld [vmem:[#allocation2 + $0x51] sm:$0xff]  ;;  %v1098_v61 = vld [vmem:[#allocation2 + $0x5a] sm:$0xff] }
 0x135   : > { %v2607_v13 = vmul.f32 %v2427_v57, %v991_v42  ;;  %v1082_v12 = vmul.f32 %v1038_v62, %v2416_v43  ;;  %v1036_v11 = vadd.f32 %v1034_v53, %v1030_v63  ;;  %v1035_v16 = vmul.f32 %v991_v42, %v2418_v37 }
 0x136   : > { %v1031_v0 = vadd.f32 %v1029_v23, %v1025_v44  ;;  %v1073_v55 = vadd.f32 %v1071_v21, %v1067_v31  ;;  %v1077_v38 = vmul.f32 %v991_v42, %v2414_v41  ;;  %v1083_v33 = vmul.f32 %v1039_v60, %v2416_v43  ;;  %v1051_v23 = vld [vmem:[#allocation2 + $0x52] sm:$0xff] }
 0x137   : > { %v1084_v9 = vadd.f32 %v1082_v12, %v1078_v51  ;;  %v1088_v7 = vmul.f32 %v1044_v52, %v2421_v48  ;;  %v2614_v47 = vadd.f32 %v987_v56, %v983_v24  ;;  %v1042_v20 = vadd.f32 %v1040_v54, %v1036_v11  ;;  %v1104_v56 = vld [vmem:[#allocation2 + $0x5b] sm:$0xff] }
 0x138   : > { %v1126_v15 = vmul.f32 %v1038_v62, %v2398_v17  ;;  %v1041_v40 = vmul.f32 %v1039_v60, %v2429_v49  ;;  %v1079_v19 = vadd.f32 %v1077_v38, %v1073_v55  ;;  %v1046_v39 = vmul.f32 %v1044_v52, %v2431_v50 }
 0x139   : > { %v1090_v53 = vadd.f32 %v1088_v7, %v1084_v9  ;;  %v1130_v2 = vmul.f32 %v1044_v52, %v2400_v18  ;;  %v1037_v63 = vadd.f32 %v1035_v16, %v1031_v0  ;;  %v1052_v28 = vmul.f32 %v2427_v57, %v1050_v1  ;;  %v1110_v16 = vld [vmem:[#allocation2 + $0x5c] sm:$0xff] }
 0x13a   : > { %v1094_v42 = vmul.f32 %v1050_v1, %v2418_v37  ;;  %v1127_v26 = vmul.f32 %v1039_v60, %v2398_v17  ;;  %v1085_v31 = vadd.f32 %v1083_v33, %v1079_v19  ;;  %v1047_v24 = vmul.f32 %v1045_v32, %v2431_v50  ;;  %v1099_v7 = vld [vmem:[#allocation2 + $0x62] sm:$0xff] }
 0x13b   : > { %v1132_v62 = vadd.f32 %v1130_v2, %v1126_v15  ;;  %v1089_v44 = vmul.f32 %v1045_v32, %v2421_v48  ;;  %v1136_v54 = vmul.f32 %v1050_v1, %v2414_v41  ;;  %v1131_v52 = vmul.f32 %v1045_v32, %v2400_v18  ;;  %v1105_v2 = vld [vmem:[#allocation2 + $0x63] sm:$0xff] }
 0x13c   : > { %v1096_v21 = vadd.f32 %v1094_v42, %v1090_v53  ;;  %v1100_v51 = vmul.f32 %v1098_v61, %v2429_v49  ;;  %v1043_v12 = vadd.f32 %v1041_v40, %v1037_v63  ;;  %v1048_v11 = vadd.f32 %v1046_v39, %v1042_v20  ;;  %v1111_v63 = vld [vmem:[#allocation2 + $0x64] sm:$0xff] }
 0x13d   : > { %v1053_v0 = vmul.f32 %v2427_v57, %v1051_v23  ;;  %v1091_v60 = vadd.f32 %v1089_v44, %v1085_v31  ;;  %v1138_v55 = vadd.f32 %v1136_v54, %v1132_v62  ;;  %v1133_v38 = vadd.f32 %v1131_v52, %v1127_v26 }
 0x13e   : > { %v1102_v9 = vadd.f32 %v1100_v51, %v1096_v21  ;;  %v1142_v33 = vmul.f32 %v1098_v61, %v2416_v43  ;;  %v1049_v15 = vadd.f32 %v1047_v24, %v1043_v12  ;;  %v1095_v1 = vmul.f32 %v1051_v23, %v2418_v37 }
 0x13f   : > { %v1186_v32 = vmul.f32 %v1098_v61, %v2398_v17  ;;  %v1190_v19 = vmul.f32 %v1104_v56, %v2400_v18  ;;  %v1137_v40 = vmul.f32 %v1051_v23, %v2414_v41  ;;  %v1106_v20 = vmul.f32 %v1104_v56, %v2431_v50 }
 0x140   : > { %v1112_v39 = vmul.f32 %v2427_v57, %v1110_v16  ;;  %v1144_v53 = vadd.f32 %v1142_v33, %v1138_v55  ;;  %v1097_v42 = vadd.f32 %v1095_v1, %v1091_v60  ;;  %v1148_v26 = vmul.f32 %v1104_v56, %v2421_v48 }
 0x141   : > { %v1154_v31 = vmul.f32 %v1110_v16, %v2418_v37  ;;  %v1101_v62 = vmul.f32 %v1099_v7, %v2429_v49  ;;  %v1139_v24 = vadd.f32 %v1137_v40, %v1133_v38  ;;  %v1108_v61 = vadd.f32 %v1106_v20, %v1102_v9 }
 0x142   : > { %v1192_v44 = vadd.f32 %v1190_v19, %v1186_v32  ;;  %v1196_v21 = vmul.f32 %v1110_v16, %v2414_v41  ;;  %v1107_v54 = vmul.f32 %v1105_v2, %v2431_v50  ;;  %v1113_v52 = vmul.f32 %v2427_v57, %v1111_v63 }
 0x143   : > { %v1103_v23 = vadd.f32 %v1101_v62, %v1097_v42  ;;  %v1143_v51 = vmul.f32 %v1099_v7, %v2416_v43  ;;  %v1150_v12 = vadd.f32 %v1148_v26, %v1144_v53  ;;  %v1149_v60 = vmul.f32 %v1105_v2, %v2421_v48 }
 0x144   : > { %v2645_v56 = vmul.f32 %v1111_v63, %v2418_v37  ;;  %v805_v55 = vmul.f32 %v2370_v4, %v2596_v6  ;;  %v1187_v9 = vmul.f32 %v1099_v7, %v2398_v17  ;;  %v940_v16 = vmin.f32 %v938_v45, 6.0 }
 0x145   : > { %v1109_v38 = vadd.f32 %v1107_v54, %v1103_v23  ;;  %v621_v33 = vmax.f32 %v2586_v29, 0.0  ;;  %v1191_v1 = vmul.f32 %v1105_v2, %v2400_v18  ;;  %v994_v32 = vadd.f32 %v2589_v22, %v2598_v3 }
 0x146   : > { %829 = vst.msk [vmem:[#allocation2 + $0x70] sm:$0xff] %vm814_vm3, %v805_v55  ;;  %v995_v19 = vadd.f32 %v2607_v13, %v2614_v47  ;;  %v1054_v40 = vadd.f32 %v1052_v28, %v1048_v11  ;;  %v1145_v4 = vadd.f32 %v1143_v51, %v1139_v24  ;;  %942 = vst.msk [vmem:[#allocation3] sm:$0xff] %vm814_vm3, %v940_v16 }
 0x147   : > { %v644_v6 = vmin.f32 %v621_v33, 6.0  ;;  %v1055_v7 = vadd.f32 %v1053_v0, %v1049_v15  ;;  %v1114_v36 = vadd.f32 %v1112_v39, %v1108_v61  ;;  %v1197_v45 = vmul.f32 %v1111_v63, %v2414_v41 }
 0x148   : > { %v996_v29 = vadd.f32 %v2543_v30, %v994_v32  ;;  %v997_v20 = vadd.f32 %v2543_v30, %v995_v19  ;;  %v1056_v53 = vadd.f32 %v2543_v30, %v1054_v40  ;;  %v1115_v47 = vadd.f32 %v1113_v52, %v1109_v38 }
 0x149   : > { %v806_v22 = vmul.f32 %v2372_v5, %v644_v6  ;;  %v1057_v3 = vadd.f32 %v2543_v30, %v1055_v7  ;;  %v1116_v13 = vadd.f32 %v2543_v30, %v1114_v36  ;;  %v1357_v0 = vadd.f32 %v2543_v30, %v2583_v46  ;;  %v1365_v5 = vld [vmem:[#allocation3 + $0x8] sm:$0xff] }
 0x14a   : > { %v998_v28 = vmax.f32 %v996_v29, 0.0  ;;  %v999_v11 = vmax.f32 %v997_v20, 0.0  ;;  %v1058_v2 = vmax.f32 %v1056_v53, 0.0  ;;  %v1193_v15 = vadd.f32 %v1191_v1, %v1187_v9 }
 0x14b   : > { %830 = vst.msk [vmem:[#allocation2 + $0x78] sm:$0xff] %vm814_vm3, %v806_v22  ;;  %v1059_v39 = vmax.f32 %v1057_v3, 0.0  ;;  %v1118_v63 = vmax.f32 %v1116_v13, 0.0  ;;  %v1117_v42 = vadd.f32 %v2543_v30, %v1115_v47  ;;  %v1151_v26 = vadd.f32 %v1149_v60, %v1145_v4 }
 0x14c   : > { %v1000_v62 = vmin.f32 %v998_v28, 6.0  ;;  %v1001_v24 = vmin.f32 %v999_v11, 6.0  ;;  %v1060_v61 = vmin.f32 %v1058_v2, 6.0  ;;  %v1359_v38 = vmax.f32 %v1357_v0, 0.0 }
 0x14d   : > { %v1158_v23 = vld [vmem:[#allocation2 + $0x6c] sm:$0xff]  ;;  %v1061_v52 = vmin.f32 %v1059_v39, 6.0  ;;  %v1120_v51 = vmin.f32 %v1118_v63, 6.0  ;;  %v1119_v55 = vmax.f32 %v1117_v42, 0.0  ;;  %v1156_v16 = vadd.f32 %v1154_v31, %v1150_v12  ;;  %v1364_v32 = vld [vmem:[#allocation3] sm:$0xff] }
 0x14e   : > { %v1164_v54 = vld [vmem:[#allocation2 + $0x6d] sm:$0xff]  ;;  %v1198_v46 = vadd.f32 %v1196_v21, %v1192_v44  ;;  %v1160_v9 = vmul.f32 %v1158_v23, %v2429_v49  ;;  %v1202_v1 = vmul.f32 %v1158_v23, %v2416_v43  ;;  %1002 = vst.msk [vmem:[#allocation3 + $0x10] sm:$0xff] %vm814_vm3, %v1000_v62  ;;  %1003 = vst.msk [vmem:[#allocation3 + $0x18] sm:$0xff] %vm814_vm3, %v1001_v24  ;;  %1872 = vmatprep.mubr.msk.f32.mxu1 %vm814_vm3, %v1364_v32 }
 0x14f   : > { %v1170_v33 = vld [vmem:[#allocation2 + $0x6e] sm:$0xff]  ;;  %1062 = vst.msk [vmem:[#allocation3 + $0x20] sm:$0xff] %vm814_vm3, %v1060_v61  ;;  %v1199_v60 = vadd.f32 %v1197_v45, %v1193_v15  ;;  %v1166_v19 = vmul.f32 %v1164_v54, %v2431_v50  ;;  %v1246_v40 = vmul.f32 %v1158_v23, %v2398_v17  ;;  %v1250_v31 = vmul.f32 %v1164_v54, %v2400_v18 }
 0x150   : > { %1063 = vst.msk [vmem:[#allocation3 + $0x28] sm:$0xff] %vm814_vm3, %v1061_v52  ;;  %1122 = vst.msk [vmem:[#allocation3 + $0x30] sm:$0xff] %vm814_vm3, %v1120_v51  ;;  %v1162_v44 = vadd.f32 %v1160_v9, %v1156_v16  ;;  %v1204_v21 = vadd.f32 %v1202_v1, %v1198_v46  ;;  %v1208_v12 = vmul.f32 %v1164_v54, %v2421_v48  ;;  %1873 = vmatmul.mubr.msk.f32.vlgmr.msra.gmra.mrb[14].mxu1 %vm814_vm3, %v1365_v5  ;;  %v1284_v51 = vld [vmem:[#allocation2 + $0x91] sm:$0xff] }
 0x151   : > { %v1121_v4 = vmin.f32 %v1119_v55, 6.0  ;;  %v1157_v6 = vadd.f32 %v2645_v56, %v1151_v26  ;;  %v1252_v7 = vadd.f32 %v1250_v31, %v1246_v40  ;;  %v1256_v36 = vmul.f32 %v1170_v33, %v2414_v41 }
 0x152   : > { %v1361_v45 = vmin.f32 %v1359_v38, 6.0  ;;  %v1168_v29 = vadd.f32 %v1166_v19, %v1162_v44  ;;  %v1172_v20 = vmul.f32 %v2427_v57, %v1170_v33  ;;  %v1210_v53 = vadd.f32 %v1208_v12, %v1204_v21  ;;  %v1159_v3 = vld [vmem:[#allocation2 + $0x74] sm:$0xff]  ;;  %v1218_v0 = vld [vmem:[#allocation2 + $0x7e] sm:$0xff] }
 0x153   : > { %v1214_v22 = vmul.f32 %v1170_v33, %v2418_v37  ;;  %v1165_v13 = vld [vmem:[#allocation2 + $0x75] sm:$0xff]  ;;  %1123 = vst.msk [vmem:[#allocation3 + $0x38] sm:$0xff] %vm814_vm3, %v1121_v4  ;;  %v1258_v28 = vadd.f32 %v1256_v36, %v1252_v7  ;;  %v1161_v11 = vmul.f32 %v1159_v3, %v2429_v49  ;;  %v1224_v15 = vld [vmem:[#allocation2 + $0x7f] sm:$0xff]  ;;  %v1203_v63 = vmul.f32 %v1159_v3, %v2416_v43 }
 0x154   : > { %v1171_v47 = vld [vmem:[#allocation2 + $0x76] sm:$0xff]  ;;  %v1167_v56 = vmul.f32 %v1165_v13, %v2431_v50  ;;  %1363 = vst.msk [vmem:[#allocation3 + $0x78] sm:$0xff] %vm814_vm3, %v1361_v45  ;;  %v1209_v42 = vmul.f32 %v1165_v13, %v2421_v48  ;;  %v1220_v62 = vmul.f32 %v1218_v0, %v2429_v49  ;;  %v1226_v24 = vmul.f32 %v1224_v15, %v2431_v50 }
 0x155   : > { %v1173_v2 = vmul.f32 %v2427_v57, %v1171_v47  ;;  %v1216_v39 = vadd.f32 %v1214_v22, %v1210_v53  ;;  %v1215_v26 = vmul.f32 %v1171_v47, %v2418_v37  ;;  %v1163_v5 = vadd.f32 %v1161_v11, %v1157_v6  ;;  %v1366_v23 = vld [vmem:[#allocation3 + $0x10] sm:$0xff]  ;;  %v1367_v54 = vld [vmem:[#allocation3 + $0x18] sm:$0xff] }
 0x156   : > { %v1247_v61 = vmul.f32 %v1159_v3, %v2398_v17  ;;  %v1368_v52 = vld [vmem:[#allocation3 + $0x20] sm:$0xff]  ;;  %v1205_v55 = vadd.f32 %v1203_v63, %v1199_v60  ;;  %v1251_v38 = vmul.f32 %v1165_v13, %v2400_v18  ;;  %v1257_v16 = vmul.f32 %v1171_v47, %v2414_v41  ;;  %1875 = vmatprep.mubr.msk.f32.mxu1 %vm814_vm3, %v1366_v23  ;;  %v2861_v63 = vld [vmem:[#allocation10_spill] sm:$0xff] }
 0x157   : > { %v1262_v46 = vmul.f32 %v1218_v0, %v2416_v43  ;;  %v1169_v9 = vadd.f32 %v1167_v56, %v1163_v5  ;;  %v1222_v33 = vadd.f32 %v1220_v62, %v1216_v39  ;;  %v1268_v1 = vmul.f32 %v1224_v15, %v2421_v48  ;;  %1876 = vmatmul.mubr.msk.f32.gmra.mrb[16].mxu1 %vm814_vm3, %v1367_v54  ;;  %v1290_v19 = vld [vmem:[#allocation2 + $0x92] sm:$0xff]  ;;  %v1369_v41 = vld [vmem:[#allocation3 + $0x28] sm:$0xff]  ;;  %v1370_v12 = vld [vmem:[#allocation3 + $0x30] sm:$0xff] }
 0x158   : > { %v1306_v32 = vmul.f32 %v1218_v0, %v2398_v17  ;;  %v1211_v40 = vadd.f32 %v1209_v42, %v1205_v55  ;;  %v1253_v31 = vadd.f32 %v1251_v38, %v1247_v61  ;;  %v1310_v44 = vmul.f32 %v1224_v15, %v2400_v18  ;;  %1878 = vmatprep.mubr.msk.f32.mxu1 %vm814_vm3, %v1368_v52  ;;  %v1338_v15 = vld [vmem:[#allocation2 + $0xa2] sm:$0xff]  ;;  %v2860_v39 = vld [vmem:[#allocation7_spill] sm:$0xff] }
 0x159   : > { %v1264_v60 = vadd.f32 %v1262_v46, %v1258_v28  ;;  %v1286_v43 = vmul.f32 %v1284_v51, %v2431_v50  ;;  %v1228_v21 = vadd.f32 %v1226_v24, %v1222_v33  ;;  %v1174_v4 = vadd.f32 %v1172_v20, %v1168_v29  ;;  %v1344_v5 = vld [vmem:[#allocation2 + $0xa3] sm:$0xff] }
 0x15a   : > { %v1175_v6 = vadd.f32 %v1173_v2, %v1169_v9  ;;  %v1217_v7 = vadd.f32 %v1215_v26, %v1211_v40  ;;  %v1259_v36 = vadd.f32 %v1257_v16, %v1253_v31  ;;  %v1312_v45 = vadd.f32 %v1310_v44, %v1306_v32  ;;  %v1371_v28 = vld [vmem:[#allocation3 + $0x38] sm:$0xff]  ;;  %v2862_v24 = vld [vmem:[#allocation8_spill] sm:$0xff]  ;;  %v2863_v54 = vld [vmem:[#allocation9_spill] sm:$0xff] }
 0x15b   : > { %v1270_v17 = vadd.f32 %v1268_v1, %v1264_v60  ;;  %v1292_v53 = vmul.f32 %v2427_v57, %v1290_v19  ;;  %1879 = vmatmul.mubr.msk.f32.gmra.mrb[18].mxu1 %vm814_vm3, %v1369_v41  ;;  %v1176_v22 = vadd.f32 %v2543_v30, %v1174_v4  ;;  %v1234_v3 = vadd.f32 %v2434_v8, %v1228_v21  ;;  %v2864_v16 = vld [vmem:[#allocation11_spill] sm:$0xff] }
 0x15c   : > { %v1177_v18 = vadd.f32 %v2543_v30, %v1175_v6  ;;  %v1223_v13 = vadd.f32 %v2453_v27, %v1217_v7  ;;  %v1265_v47 = vadd.f32 %v2465_v34, %v1259_v36  ;;  %v1318_v20 = vadd.f32 %v2450_v25, %v1312_v45  ;;  %1881 = vmatprep.mubr.msk.f32.mxu1 %vm814_vm3, %v1370_v12 }
 0x15d   : > { %v1276_v29 = vadd.f32 %v2437_v10, %v1270_v17  ;;  %v1328_v11 = vmul.f32 %v1284_v51, %v2421_v48  ;;  %v1178_v56 = vmax.f32 %v1176_v22, 0.0  ;;  %v1236_v0 = vadd.f32 %v2543_v30, %v1234_v3  ;;  %v1350_v51 = vld [vmem:[#allocation2 + $0xa4] sm:$0xff]  ;;  %v1729_v3 = vld [vmem:[%s2851_s7] ss:$0 sm:$0xff] }
 0x15e   : > { %v1179_v2 = vmax.f32 %v1177_v18, 0.0  ;;  %v1271_v8 = vadd.f32 %v2468_v35, %v1265_v47  ;;  %v1324_v27 = vadd.f32 %v2489_v58, %v1318_v20  ;;  %v1229_v34 = vadd.f32 %v2860_v39, %v1223_v13  ;;  %v1379_v18 = vld [vmem:[#allocation3 + $0x78] sm:$0xff] }
 0x15f   : > { %v1282_v10 = vadd.f32 %v2861_v63, %v1276_v29  ;;  %v1334_v25 = vmul.f32 %v1290_v19, %v2418_v37  ;;  %1882 = vmatmul.mubr.msk.f32.gmra.mrb[20].mxu1 %vm814_vm3, %v1371_v28  ;;  %v1180_v42 = vmin.f32 %v1178_v56, 6.0  ;;  %v1238_v48 = vmax.f32 %v1236_v0, 0.0 }
 0x160   : > { %v1181_v26 = vmin.f32 %v1179_v2, 6.0  ;;  %v1330_v62 = vadd.f32 %v1328_v11, %v1324_v27  ;;  %v1235_v61 = vadd.f32 %v2862_v24, %v1229_v34  ;;  %v1277_v35 = vadd.f32 %v2863_v54, %v1271_v8 }
 0x161   : > { %v1288_v23 = vadd.f32 %v1286_v43, %v1282_v10  ;;  %v1287_v58 = vmul.f32 %v2504_v14, %v2431_v50  ;;  %v1340_v52 = vmul.f32 %v1338_v15, %v2429_v49  ;;  %1182 = vst.msk [vmem:[#allocation3 + $0x40] sm:$0xff] %vm814_vm3, %v1180_v42  ;;  %v1240_v37 = vmin.f32 %v1238_v48, 6.0 }
 0x162   : > { %1183 = vst.msk [vmem:[#allocation3 + $0x48] sm:$0xff] %vm814_vm3, %v1181_v26  ;;  %v1237_v55 = vadd.f32 %v2543_v30, %v1235_v61  ;;  %v1283_v46 = vadd.f32 %v2864_v16, %v1277_v35  ;;  %v1336_v9 = vadd.f32 %v1334_v25, %v1330_v62  ;;  %v1293_v33 = vmul.f32 %v2427_v57, %v2516_v59 }
 0x163   : > { %v1294_v38 = vadd.f32 %v1292_v53, %v1288_v23  ;;  %v1346_v1 = vmul.f32 %v1344_v5, %v2431_v50  ;;  %1242 = vst.msk [vmem:[#allocation3 + $0x50] sm:$0xff] %vm814_vm3, %v1240_v37  ;;  %v1352_v40 = vmul.f32 %v2427_v57, %v1350_v51 }
 0x164   : > { %v1239_v49 = vmax.f32 %v1237_v55, 0.0  ;;  %v1289_v32 = vadd.f32 %v1287_v58, %v1283_v46  ;;  %v1342_v19 = vadd.f32 %v1340_v52, %v1336_v9 }
 0x165   : > { %v1296_v14 = vadd.f32 %v2543_v30, %v1294_v38 }
 0x166   : > { %v1241_v31 = vmin.f32 %v1239_v49, 6.0  ;;  %v1295_v44 = vadd.f32 %v1293_v33, %v1289_v32  ;;  %v1348_v41 = vadd.f32 %v1346_v1, %v1342_v19 }
 0x167   : > { %v1298_v60 = vmax.f32 %v1296_v14, 0.0 }
 0x168   : > { %v1372_v43 = vld [vmem:[#allocation3 + $0x40] sm:$0xff]  ;;  %1243 = vst.msk [vmem:[#allocation3 + $0x58] sm:$0xff] %vm814_vm3, %v1241_v31  ;;  %v1297_v50 = vadd.f32 %v2543_v30, %v1295_v44  ;;  %v1354_v12 = vadd.f32 %v1352_v40, %v1348_v41 }
 0x169   : > { %v1373_v21 = vld [vmem:[#allocation3 + $0x48] sm:$0xff]  ;;  %v1300_v59 = vmin.f32 %v1298_v60, 6.0  ;;  %1884 = vmatprep.mubr.msk.f32.mxu1 %vm814_vm3, %v1372_v43 }
 0x16a   : > { %1885 = vmatmul.mubr.msk.f32.gmra.mrb[22].mxu1 %vm814_vm3, %v1373_v21  ;;  %v1374_v4 = vld [vmem:[#allocation3 + $0x50] sm:$0xff]  ;;  %v1299_v57 = vmax.f32 %v1297_v50, 0.0  ;;  %v1356_v6 = vadd.f32 %v2543_v30, %v1354_v12 }
 0x16b   : > { %1302 = vst.msk [vmem:[#allocation3 + $0x60] sm:$0xff] %vm814_vm3, %v1300_v59  ;;  %1887 = vmatprep.mubr.msk.f32.mxu1 %vm814_vm3, %v1374_v4 }
 0x16c   : > { %v1301_v7 = vmin.f32 %v1299_v57, 6.0  ;;  %v1358_v36 = vmax.f32 %v1356_v6, 0.0 }
 0x16e   : > { %1303 = vst.msk [vmem:[#allocation3 + $0x68] sm:$0xff] %vm814_vm3, %v1301_v7  ;;  %v1360_v17 = vmin.f32 %v1358_v36, 6.0 }
 0x16f   : > { %v1375_v45 = vld [vmem:[#allocation3 + $0x58] sm:$0xff] }
 0x170   : > { %1888 = vmatmul.mubr.msk.f32.gmra.mrb[24].mxu1 %vm814_vm3, %v1375_v45  ;;  %1362 = vst.msk [vmem:[#allocation3 + $0x70] sm:$0xff] %vm814_vm3, %v1360_v17 }
 0x172   : > { %v1376_v53 = vld [vmem:[#allocation3 + $0x60] sm:$0xff] }
 0x173   : > { %1890 = vmatprep.mubr.msk.f32.mxu1 %vm814_vm3, %v1376_v53 }
 0x175   : > { %v1377_v22 = vld [vmem:[#allocation3 + $0x68] sm:$0xff] }
 0x176   : > { %1891 = vmatmul.mubr.msk.f32.gmra.mrb[26].mxu1 %vm814_vm3, %v1377_v22 }
 0x177   : > { %v1378_v30 = vld [vmem:[#allocation3 + $0x70] sm:$0xff] }
 0x178   : > { %1893 = vmatprep.mubr.msk.f32.mxu1 %vm814_vm3, %v1378_v30 }
 0x17a   : > { %1894 = vmatmul.mubr.msk.f32.gmra.mrb[28].mxu1 %vm814_vm3, %v1379_v18 }
 0x223   : > { %v1874_v13 = vpop.f32.mrb[14].mxu1 }
 0x224   : > { %v1510_v47 = vadd.f32 %v1874_v13, %v1729_v3  ;;  %v1504_v29 = vpop.f32.mrb[15].mxu1 }
 0x225   : > { %v1505_v20 = vadd.f32 %v1729_v3, %v1504_v29 }
 0x226   : > { %1584 = vst [vmem:[%s2762_s26 + $0x8] sm:$0xff] %v1510_v47 }
 0x227   : > { %1583 = vst [vmem:[%s2762_s26] sm:$0xff] %v1505_v20 }
 0x22a   : > { %v1877_v28 = vpop.f32.mrb[16].mxu1 }
 0x22b   : > { %v1520_v11 = vadd.f32 %v1877_v28, %v1729_v3  ;;  %v1514_v56 = vpop.f32.mrb[17].mxu1 }
 0x22c   : > { %v1515_v2 = vadd.f32 %v1729_v3, %v1514_v56 }
 0x22d   : > { %1586 = vst [vmem:[%s2762_s26 + $0x18] sm:$0xff] %v1520_v11 }
 0x22e   : > { %1585 = vst [vmem:[%s2762_s26 + $0x10] sm:$0xff] %v1515_v2  ;;  %v1880_v0 = vpop.f32.mrb[18].mxu1 }
 0x22f   : > { %v1530_v15 = vadd.f32 %v1880_v0, %v1729_v3  ;;  %v1524_v8 = vpop.f32.mrb[19].mxu1 }
 0x230   : > { %v1525_v27 = vadd.f32 %v1729_v3, %v1524_v8 }
 0x231   : > { %1588 = vst [vmem:[%s2762_s26 + $0x28] sm:$0xff] %v1530_v15 }
 0x232   : > { %1587 = vst [vmem:[%s2762_s26 + $0x20] sm:$0xff] %v1525_v27  ;;  %v1883_v39 = vpop.f32.mrb[20].mxu1 }
 0x233   : > { %v1540_v34 = vadd.f32 %v1883_v39, %v1729_v3  ;;  %v1534_v63 = vpop.f32.mrb[21].mxu1 }
 0x234   : > { %v1535_v10 = vadd.f32 %v1729_v3, %v1534_v63 }
 0x235   : > { %1590 = vst [vmem:[%s2762_s26 + $0x38] sm:$0xff] %v1540_v34 }
 0x236   : > { %1589 = vst [vmem:[%s2762_s26 + $0x30] sm:$0xff] %v1535_v10 }
 0x23d   : > { %v1886_v25 = vpop.f32.mrb[22].mxu1 }
 0x23e   : > { %v1550_v42 = vadd.f32 %v1886_v25, %v1729_v3  ;;  %v1544_v26 = vpop.f32.mrb[23].mxu1 }
 0x23f   : > { %v1545_v48 = vadd.f32 %v1729_v3, %v1544_v26 }
 0x240   : > { %1592 = vst [vmem:[%s2762_s26 + $0x48] sm:$0xff] %v1550_v42 }
 0x241   : > { %1591 = vst [vmem:[%s2762_s26 + $0x40] sm:$0xff] %v1545_v48 }
 0x243   : > { %v1889_v5 = vpop.f32.mrb[24].mxu1 }
 0x244   : > { %v1560_v62 = vadd.f32 %v1889_v5, %v1729_v3  ;;  %v1554_v24 = vpop.f32.mrb[25].mxu1 }
 0x245   : > { %v1555_v61 = vadd.f32 %v1729_v3, %v1554_v24 }
 0x246   : > { %1594 = vst [vmem:[%s2762_s26 + $0x58] sm:$0xff] %v1560_v62 }
 0x247   : > { %1593 = vst [vmem:[%s2762_s26 + $0x50] sm:$0xff] %v1555_v61 }
 0x249   : > { %v1892_v23 = vpop.f32.mrb[26].mxu1 }
 0x24a   : > { %v1570_v54 = vadd.f32 %v1892_v23, %v1729_v3  ;;  %v1564_v35 = vpop.f32.mrb[27].mxu1 }
 0x24b   : > { %v1565_v58 = vadd.f32 %v1729_v3, %v1564_v35 }
 0x24c   : > { %1596 = vst [vmem:[%s2762_s26 + $0x68] sm:$0xff] %v1570_v54 }
 0x24d   : > { %1595 = vst [vmem:[%s2762_s26 + $0x60] sm:$0xff] %v1565_v58  ;;  %v1895_v52 = vpop.f32.mrb[28].mxu1 }
 0x24e   : > { %v1580_v37 = vadd.f32 %v1895_v52, %v1729_v3  ;;  %v1574_v51 = vpop.f32.mrb[29].mxu1 }
 0x24f   : > { %v1575_v55 = vadd.f32 %v1729_v3, %v1574_v51 }
 0x250   : > { %1598 = vst [vmem:[%s2762_s26 + $0x78] sm:$0xff] %v1580_v37 }
 0x251   : > { %1597 = vst [vmem:[%s2762_s26 + $0x70] sm:$0xff] %v1575_v55 }
 0x252   : > { %1994 = shalt.err (!%p1991_p6)
}
 0x253   : > { %s1995_s22 = scalar_lea.hbm %s2784_s25, 2048  ;;  %s1999_s9 = scalar_lea.hbm %s2852_s8, 8192 }
 0x254   : > { %p1996_p7 = scmp.ne.s32.totalorder %s2784_s25, %s1995_s22  ;;  %p2000_p11 = scmp.lt.u32.totalorder %s2784_s25, %s2852_s8 }
 0x255   : > { %p2001_p12 = scmp.lt.u32.totalorder %s1999_s9, %s1995_s22  ;;  %p2003_p0 = scmp.lt.u32.totalorder %s1995_s22, %s2784_s25 }
 0x256   : > { %p1997_p9 = pnand %p1996_p7, %p2179_p3 }
 0x257   : > { %p2002_p13 = por %p2001_p12, %p2000_p11 }
 0x258   : > { %p1998_p10 = pneg %p1997_p9 }
 0x259   : > { %p2004_p1 = por %p2003_p0, %p2002_p13 }
 0x25b   : > { %p2005_p2 = pnand %p2004_p1, %p1998_p10 }
 0x25d   : > { %2008 = shalt.err (!%p2005_p2)
}
 0x25e   : > { %s2081_s13 = smov 128   ;;  %s2082_s21 = smov 8  }
 0x25f   : > { %1903 = dma.vmem_to_hbm [thread:$0]  (%p2179_p3), %s2786_s24, 2048, %s2784_s25, %s2792_s14, %s2081_s13, %s2081_s13, %s2082_s21  }
 0x260 PF: > { %p1909_p4 = scmp.ge.s32.totalorder %s2075_s12, 2  ;;  %s1630_s26 = sand.u32 1, %s2047_s27  }
 0x261   : > { %s1631_s22 = scalar_lea.sflag [#allocation5], %s1630_s26 }
 0x262   : > { %p1906_p5 = pnand %p1909_p4, %p2188_p8 }
 0x264   : > { %2042 = dma.done.wait (!%p1906_p5), %s1631_s22, 2048  }
 0x265   : > { %2044 = vsyncadd (!%p1906_p5), %s1631_s22, 4294965248  ;;  %s21_s12 = sadd.s32 1, %s2075_s12   ;;  %s2865_s27 = smov %s2051_s28 }
 0x266   : > { %p18_p6 = scmp.ge.s32.totalorder %s21_s12, 6   ;;  %s2866_s28 = smov %s2055_s29 }
 0x267   : > { %s2867_s29 = smov %s2197_s23  ;;  %s2868_s30 = smov %s2067_s10 }
 0x268   : > { %s2869_s9 = smov %s2071_s11  ;;  %s2870_s10 = smov %s2873_s15 }
 0x269   : > { %s2871_s11 = smov %s2877_s16  ;;  %20 = sbr.rel (!%p18_p6) target bundleno = 5 (0x5), region = 89 }
 0x270   :  { %1636 = vsyncpa [#allocation5], 1 }
 0x271   :  { %1638 = vsyncpa [#allocation5 + $0x1], 1 }

</bundles_post_ra>
